<compile_context>
chip_gen: v7x
topology: tpu7x:2x2x1
jax: 0.10.0
libtpu: 0.0.40
codegen_flags: <defaults>
</compile_context>

<pallas_src>
import functools

import jax
import jax.numpy as jnp
from jax.experimental import pallas as pl
from jax.experimental.pallas import tpu as pltpu

N_FEATURES = 11
LAYER_DIMS = [
    (11, 100),   # in_layer
    (100, 100),  # layer1
    (100, 100),  # layer2
    (100, 50),   # layer3
    (50, 20),    # layer4
    (20, 10),    # layer5  (latent)
    (10, 20),    # layer6
    (20, 50),    # layer7
    (50, 100),   # layer8
    (100, 100),  # layer9
    (100, 100),  # layer10
    (100, 11),   # out_layer
]
N_LAYERS = len(LAYER_DIMS)
PAD = 128        # padded feature width (one vreg lane extent)


def _ae_kernel(x_ref, w_ref, b_ref, o_ref, h_ref):
    """x_ref: (TB, 11) f32; w_ref: (L, 128, 128) bf16; b_ref: (L, 1, 128) f32;
       o_ref: (TB, 128) bf16; h_ref: (TB, 128) bf16 VMEM activation scratch."""
    tb = x_ref.shape[0]

    # Lane-widen the (TB, 11) tile to 128 columns directly into the activation
    # buffer: two masked stores covering exactly 128 lanes total (no full-slab
    # zero-fill followed by an overwrite, as in the previous version).  The
    # explicit zero padding is mandatory: stale VMEM lanes could hold NaN/Inf
    # and NaN * 0-weight = NaN.
    h_ref[:, :N_FEATURES] = x_ref[...].astype(jnp.bfloat16)
    h_ref[:, N_FEATURES:] = jnp.zeros((tb, PAD - N_FEATURES), jnp.bfloat16)

    # Static (unrolled) 12-layer chain.  Every layer round-trips through the
    # bf16 h_ref scratch, which bounds live ranges (no 12-deep chain of
    # (TB, 128) values competing for 64 vregs at the larger batch tile) while
    # keeping each jnp.dot a single lane-dense MXU call with f32 accumulation.
    # Zero-padded weight rows/cols and zero-padded biases keep the padded
    # lanes exactly 0 through every ReLU.
    for i in range(N_LAYERS):
        acc = jnp.dot(h_ref[...], w_ref[i], preferred_element_type=jnp.float32)
        act = jnp.maximum(acc + b_ref[i], 0.0).astype(jnp.bfloat16)
        if i < N_LAYERS - 1:
            h_ref[...] = act
        else:
            o_ref[...] = act          # lane-dense 128-col bf16 store


@functools.partial(jax.jit, static_argnames=("batch_tile",))
def _autoencoder_forward_impl(x, w_stack, b_stack, batch_tile):
    B = x.shape[0]
    b_padded = ((B + batch_tile - 1) // batch_tile) * batch_tile
    if b_padded != B:
        x = jnp.concatenate(
            [x, jnp.zeros((b_padded - B, N_FEATURES), x.dtype)], axis=0)

    out_pad = pl.pallas_call(
        _ae_kernel,
        out_shape=jax.ShapeDtypeStruct((b_padded, PAD), jnp.bfloat16),
        grid_spec=pltpu.PrefetchScalarGridSpec(
            num_scalar_prefetch=0,
            grid=(b_padded // batch_tile,),
            in_specs=[
                # Raw (B, 11) input: 11 is the full last dim, so this is legal
                # and keeps input DMA bytes minimal (44 B/row).
                pl.BlockSpec((batch_tile, N_FEATURES), lambda i: (i, 0)),
                # Constant index maps: weights/biases are revisited blocks and
                # stay resident in VMEM across all grid steps.  (Default
                # double-buffering of ~0.4 MiB is negligible at this VMEM
                # footprint, so pipeline_mode=Buffered(1) is intentionally
                # not used.)
                pl.BlockSpec((N_LAYERS, PAD, PAD), lambda i: (0, 0, 0)),
                pl.BlockSpec((N_LAYERS, 1, PAD), lambda i: (0, 0, 0)),
            ],
            out_specs=pl.BlockSpec((batch_tile, PAD), lambda i: (i, 0)),
            scratch_shapes=[pltpu.VMEM((batch_tile, PAD), jnp.bfloat16)],
        ),
        compiler_params=pltpu.CompilerParams(
            dimension_semantics=("parallel",)),
    )(x, w_stack, b_stack)

    # Single slice + cast pass; padded batch rows (ReLU(bias) != 0) and the
    # 117 padding lanes are dropped here.
    return out_pad[:B, :N_FEATURES].astype(jnp.float32)


_TILE_CANDIDATES = (512, 256, 128, 64, 32, 16, 8)


def _auto_batch_tile(B):
    """Largest tile (cap 512) leaving >= 4 grid steps (2 per TC on v7x);
    fall back to >= 2 steps (still pipelines input/output DMAs)."""
    for t in _TILE_CANDIDATES:
        if B >= 4 * t:
            return t
    for t in _TILE_CANDIDATES:
        if B >= 2 * t:
            return t
    return _TILE_CANDIDATES[-1]


def autoencoder_forward(x, w_stack_bf16, b_stack_f32, batch_tile=None):
    """x: (B, N_FEATURES) f32. Returns (B, N_FEATURES) f32."""
    if batch_tile is None:
        batch_tile = _auto_batch_tile(x.shape[0])
    return _autoencoder_forward_impl(x, w_stack_bf16, b_stack_f32, batch_tile)


def init_params(key):
    """Deterministic synthetic f32 master params, zero-padded into 128x128 tiles."""
    w_stack = jnp.zeros((N_LAYERS, PAD, PAD), jnp.float32)
    b_stack = jnp.zeros((N_LAYERS, 1, PAD), jnp.float32)
    for i, (d_in, d_out) in enumerate(LAYER_DIMS):
        key, kw, kb = jax.random.split(key, 3)
        bound = 1.0 / (d_in ** 0.5)  # same scale as torch.nn.Linear default
        w = jax.random.uniform(kw, (d_in, d_out), jnp.float32, -bound, bound)
        b = jax.random.uniform(kb, (d_out,), jnp.float32, -bound, bound)
        w_stack = w_stack.at[i, :d_in, :d_out].set(w)
        b_stack = b_stack.at[i, 0, :d_out].set(b)
    return w_stack, b_stack


def reference_forward(x, w_stack_f32, b_stack_f32):
    """Pure-JAX f32 reference (operates on the un-padded sub-blocks)."""
    h = x
    for i, (d_in, d_out) in enumerate(LAYER_DIMS):
        w = w_stack_f32[i, :d_in, :d_out]
        b = b_stack_f32[i, 0, :d_out]
        h = jnp.maximum(h @ w + b, 0.0)
    return h


if __name__ == "__main__":
    key = jax.random.PRNGKey(0)
    kp, kx = jax.random.split(key)

    w32, b32 = init_params(kp)
    w16 = w32.astype(jnp.bfloat16)        # bf16 weights feed the MXU natively

    batch = 512                           # -> 4 grid steps of 128 rows
    x = jax.random.normal(kx, (batch, N_FEATURES), jnp.float32)

    out = autoencoder_forward(x, w16, b32)
    out = jax.block_until_ready(out)

    # Reference uses the same (bf16-quantized) weights in f32 math, so the
    # only differences are bf16 activation/output rounding + MXU accumulation
    # order.
    ref = reference_forward(x, w16.astype(jnp.float32), b32)
    assert out.shape == (batch, N_FEATURES)
    assert jnp.allclose(out, ref, atol=5e-2, rtol=5e-2), (
        f"mismatch vs reference, max abs err = {jnp.max(jnp.abs(out - ref))}")

    print("KERNEL_OK")
</pallas_src>

<mosaic_0001>
module attributes {stable_mosaic.version = 11 : i64} {
  func.func @_ae_kernel(%arg0: i32, %arg1: memref<128x11xf32, #tpu.memory_space<vmem>>, %arg2: memref<12x128x128xbf16, #tpu.memory_space<vmem>>, %arg3: memref<12x1x128xf32, #tpu.memory_space<vmem>>, %arg4: memref<128x128xbf16, #tpu.memory_space<vmem>>, %arg5: memref<128x128xbf16, #tpu.memory_space<vmem>>) attributes {dimension_semantics = [#tpu.dimension_semantics<parallel>], iteration_bounds = array<i64: 4>, scalar_prefetch = 0 : i64, scratch_operands = 1 : i64, tpu.core_type = #tpu.core_type<tc>, window_params = [{transform_indices = @transform_0, window_bounds = array<i64: 128, 11>}, {pipeline_mode = #tpu.pipeline_mode<synchronous>, transform_indices = @transform_1, window_bounds = array<i64: 12, 128, 128>}, {pipeline_mode = #tpu.pipeline_mode<synchronous>, transform_indices = @transform_2, window_bounds = array<i64: 12, 1, 128>}, {transform_indices = @transform_3, window_bounds = array<i64: 128, 128>}]} {
    %c0 = arith.constant 0 : index
    %c0_0 = arith.constant 0 : index
    %0 = vector.load %arg1[%c0, %c0_0] : memref<128x11xf32, #tpu.memory_space<vmem>>, vector<128x11xf32>
    %1 = arith.truncf %0 : vector<128x11xf32> to vector<128x11xbf16>
    %c0_1 = arith.constant 0 : index
    %c0_2 = arith.constant 0 : index
    %2 = vector.load %arg5[%c0_1, %c0_2] : memref<128x128xbf16, #tpu.memory_space<vmem>>, vector<128x11xbf16>
    tpu.vector_store %arg5[%c0_1, %c0_2], %1 {strides = array<i32>} : memref<128x128xbf16, #tpu.memory_space<vmem>>, vector<128x11xbf16>,
    %cst = arith.constant 0.000000e+00 : bf16
    %3 = vector.broadcast %cst : bf16 to vector<128x117xbf16>
    %c0_3 = arith.constant 0 : index
    %c11 = arith.constant 11 : index
    %4 = vector.load %arg5[%c0_3, %c11] : memref<128x128xbf16, #tpu.memory_space<vmem>>, vector<128x117xbf16>
    tpu.vector_store %arg5[%c0_3, %c11], %3 {strides = array<i32>} : memref<128x128xbf16, #tpu.memory_space<vmem>>, vector<128x117xbf16>,
    %c0_4 = arith.constant 0 : index
    %c0_5 = arith.constant 0 : index
    %5 = vector.load %arg5[%c0_4, %c0_5] : memref<128x128xbf16, #tpu.memory_space<vmem>>, vector<128x128xbf16>
    %c0_6 = arith.constant 0 : index
    %c0_7 = arith.constant 0 : index
    %c0_8 = arith.constant 0 : index
    %6 = vector.load %arg2[%c0_6, %c0_7, %c0_8] : memref<12x128x128xbf16, #tpu.memory_space<vmem>>, vector<1x128x128xbf16>
    %7 = vector.shape_cast %6 : vector<1x128x128xbf16> to vector<128x128xbf16>
    %cst_9 = arith.constant dense<0.000000e+00> : vector<128x128xf32>
    %8 = tpu.matmul %5, %7, %cst_9 {dimension_numbers = #tpu.dot_dimension_numbers<[1], [0], [0], [1], [0, 0, 1, 1], [], []>} : vector<128x128xbf16>, vector<128x128xbf16>, vector<128x128xf32> -> vector<128x128xf32>
    %c0_10 = arith.constant 0 : index
    %c0_11 = arith.constant 0 : index
    %c0_12 = arith.constant 0 : index
    %9 = vector.load %arg3[%c0_10, %c0_11, %c0_12] : memref<12x1x128xf32, #tpu.memory_space<vmem>>, vector<1x1x128xf32>
    %10 = vector.shape_cast %9 : vector<1x1x128xf32> to vector<1x128xf32>
    %11 = vector.broadcast %10 : vector<1x128xf32> to vector<128x128xf32>
    %12 = arith.addf %8, %11 : vector<128x128xf32>
    %cst_13 = arith.constant 0.000000e+00 : f32
    %13 = vector.broadcast %cst_13 : f32 to vector<128x128xf32>
    %14 = arith.maximumf %12, %13 : vector<128x128xf32>
    %15 = arith.truncf %14 : vector<128x128xf32> to vector<128x128xbf16>
    %c0_14 = arith.constant 0 : index
    %c0_15 = arith.constant 0 : index
    %16 = vector.load %arg5[%c0_14, %c0_15] : memref<128x128xbf16, #tpu.memory_space<vmem>>, vector<128x128xbf16>
    tpu.vector_store %arg5[%c0_14, %c0_15], %15 {strides = array<i32>} : memref<128x128xbf16, #tpu.memory_space<vmem>>, vector<128x128xbf16>,
    %c0_16 = arith.constant 0 : index
    %c0_17 = arith.constant 0 : index
    %17 = vector.load %arg5[%c0_16, %c0_17] : memref<128x128xbf16, #tpu.memory_space<vmem>>, vector<128x128xbf16>
    %c1 = arith.constant 1 : index
    %c0_18 = arith.constant 0 : index
    %c0_19 = arith.constant 0 : index
    %18 = vector.load %arg2[%c1, %c0_18, %c0_19] : memref<12x128x128xbf16, #tpu.memory_space<vmem>>, vector<1x128x128xbf16>
    %19 = vector.shape_cast %18 : vector<1x128x128xbf16> to vector<128x128xbf16>
    %cst_20 = arith.constant dense<0.000000e+00> : vector<128x128xf32>
    %20 = tpu.matmul %17, %19, %cst_20 {dimension_numbers = #tpu.dot_dimension_numbers<[1], [0], [0], [1], [0, 0, 1, 1], [], []>} : vector<128x128xbf16>, vector<128x128xbf16>, vector<128x128xf32> -> vector<128x128xf32>
    %c1_21 = arith.constant 1 : index
    %c0_22 = arith.constant 0 : index
    %c0_23 = arith.constant 0 : index
    %21 = vector.load %arg3[%c1_21, %c0_22, %c0_23] : memref<12x1x128xf32, #tpu.memory_space<vmem>>, vector<1x1x128xf32>
    %22 = vector.shape_cast %21 : vector<1x1x128xf32> to vector<1x128xf32>
    %23 = vector.broadcast %22 : vector<1x128xf32> to vector<128x128xf32>
    %24 = arith.addf %20, %23 : vector<128x128xf32>
    %cst_24 = arith.constant 0.000000e+00 : f32
    %25 = vector.broadcast %cst_24 : f32 to vector<128x128xf32>
    %26 = arith.maximumf %24, %25 : vector<128x128xf32>
    %27 = arith.truncf %26 : vector<128x128xf32> to vector<128x128xbf16>
    %c0_25 = arith.constant 0 : index
    %c0_26 = arith.constant 0 : index
    %28 = vector.load %arg5[%c0_25, %c0_26] : memref<128x128xbf16, #tpu.memory_space<vmem>>, vector<128x128xbf16>
    tpu.vector_store %arg5[%c0_25, %c0_26], %27 {strides = array<i32>} : memref<128x128xbf16, #tpu.memory_space<vmem>>, vector<128x128xbf16>,
    %c0_27 = arith.constant 0 : index
    %c0_28 = arith.constant 0 : index
    %29 = vector.load %arg5[%c0_27, %c0_28] : memref<128x128xbf16, #tpu.memory_space<vmem>>, vector<128x128xbf16>
    %c2 = arith.constant 2 : index
    %c0_29 = arith.constant 0 : index
    %c0_30 = arith.constant 0 : index
    %30 = vector.load %arg2[%c2, %c0_29, %c0_30] : memref<12x128x128xbf16, #tpu.memory_space<vmem>>, vector<1x128x128xbf16>
    %31 = vector.shape_cast %30 : vector<1x128x128xbf16> to vector<128x128xbf16>
    %cst_31 = arith.constant dense<0.000000e+00> : vector<128x128xf32>
    %32 = tpu.matmul %29, %31, %cst_31 {dimension_numbers = #tpu.dot_dimension_numbers<[1], [0], [0], [1], [0, 0, 1, 1], [], []>} : vector<128x128xbf16>, vector<128x128xbf16>, vector<128x128xf32> -> vector<128x128xf32>
    %c2_32 = arith.constant 2 : index
    %c0_33 = arith.constant 0 : index
    %c0_34 = arith.constant 0 : index
    %33 = vector.load %arg3[%c2_32, %c0_33, %c0_34] : memref<12x1x128xf32, #tpu.memory_space<vmem>>, vector<1x1x128xf32>
    %34 = vector.shape_cast %33 : vector<1x1x128xf32> to vector<1x128xf32>
    %35 = vector.broadcast %34 : vector<1x128xf32> to vector<128x128xf32>
    %36 = arith.addf %32, %35 : vector<128x128xf32>
    %cst_35 = arith.constant 0.000000e+00 : f32
    %37 = vector.broadcast %cst_35 : f32 to vector<128x128xf32>
    %38 = arith.maximumf %36, %37 : vector<128x128xf32>
    %39 = arith.truncf %38 : vector<128x128xf32> to vector<128x128xbf16>
    %c0_36 = arith.constant 0 : index
    %c0_37 = arith.constant 0 : index
    %40 = vector.load %arg5[%c0_36, %c0_37] : memref<128x128xbf16, #tpu.memory_space<vmem>>, vector<128x128xbf16>
    tpu.vector_store %arg5[%c0_36, %c0_37], %39 {strides = array<i32>} : memref<128x128xbf16, #tpu.memory_space<vmem>>, vector<128x128xbf16>,
    %c0_38 = arith.constant 0 : index
    %c0_39 = arith.constant 0 : index
    %41 = vector.load %arg5[%c0_38, %c0_39] : memref<128x128xbf16, #tpu.memory_space<vmem>>, vector<128x128xbf16>
    %c3 = arith.constant 3 : index
    %c0_40 = arith.constant 0 : index
    %c0_41 = arith.constant 0 : index
    %42 = vector.load %arg2[%c3, %c0_40, %c0_41] : memref<12x128x128xbf16, #tpu.memory_space<vmem>>, vector<1x128x128xbf16>
    %43 = vector.shape_cast %42 : vector<1x128x128xbf16> to vector<128x128xbf16>
    %cst_42 = arith.constant dense<0.000000e+00> : vector<128x128xf32>
    %44 = tpu.matmul %41, %43, %cst_42 {dimension_numbers = #tpu.dot_dimension_numbers<[1], [0], [0], [1], [0, 0, 1, 1], [], []>} : vector<128x128xbf16>, vector<128x128xbf16>, vector<128x128xf32> -> vector<128x128xf32>
    %c3_43 = arith.constant 3 : index
    %c0_44 = arith.constant 0 : index
    %c0_45 = arith.constant 0 : index
    %45 = vector.load %arg3[%c3_43, %c0_44, %c0_45] : memref<12x1x128xf32, #tpu.memory_space<vmem>>, vector<1x1x128xf32>
    %46 = vector.shape_cast %45 : vector<1x1x128xf32> to vector<1x128xf32>
    %47 = vector.broadcast %46 : vector<1x128xf32> to vector<128x128xf32>
    %48 = arith.addf %44, %47 : vector<128x128xf32>
    %cst_46 = arith.constant 0.000000e+00 : f32
    %49 = vector.broadcast %cst_46 : f32 to vector<128x128xf32>
    %50 = arith.maximumf %48, %49 : vector<128x128xf32>
    %51 = arith.truncf %50 : vector<128x128xf32> to vector<128x128xbf16>
    %c0_47 = arith.constant 0 : index
    %c0_48 = arith.constant 0 : index
    %52 = vector.load %arg5[%c0_47, %c0_48] : memref<128x128xbf16, #tpu.memory_space<vmem>>, vector<128x128xbf16>
    tpu.vector_store %arg5[%c0_47, %c0_48], %51 {strides = array<i32>} : memref<128x128xbf16, #tpu.memory_space<vmem>>, vector<128x128xbf16>,
    %c0_49 = arith.constant 0 : index
    %c0_50 = arith.constant 0 : index
    %53 = vector.load %arg5[%c0_49, %c0_50] : memref<128x128xbf16, #tpu.memory_space<vmem>>, vector<128x128xbf16>
    %c4 = arith.constant 4 : index
    %c0_51 = arith.constant 0 : index
    %c0_52 = arith.constant 0 : index
    %54 = vector.load %arg2[%c4, %c0_51, %c0_52] : memref<12x128x128xbf16, #tpu.memory_space<vmem>>, vector<1x128x128xbf16>
    %55 = vector.shape_cast %54 : vector<1x128x128xbf16> to vector<128x128xbf16>
    %cst_53 = arith.constant dense<0.000000e+00> : vector<128x128xf32>
    %56 = tpu.matmul %53, %55, %cst_53 {dimension_numbers = #tpu.dot_dimension_numbers<[1], [0], [0], [1], [0, 0, 1, 1], [], []>} : vector<128x128xbf16>, vector<128x128xbf16>, vector<128x128xf32> -> vector<128x128xf32>
    %c4_54 = arith.constant 4 : index
    %c0_55 = arith.constant 0 : index
    %c0_56 = arith.constant 0 : index
    %57 = vector.load %arg3[%c4_54, %c0_55, %c0_56] : memref<12x1x128xf32, #tpu.memory_space<vmem>>, vector<1x1x128xf32>
    %58 = vector.shape_cast %57 : vector<1x1x128xf32> to vector<1x128xf32>
    %59 = vector.broadcast %58 : vector<1x128xf32> to vector<128x128xf32>
    %60 = arith.addf %56, %59 : vector<128x128xf32>
    %cst_57 = arith.constant 0.000000e+00 : f32
    %61 = vector.broadcast %cst_57 : f32 to vector<128x128xf32>
    %62 = arith.maximumf %60, %61 : vector<128x128xf32>
    %63 = arith.truncf %62 : vector<128x128xf32> to vector<128x128xbf16>
    %c0_58 = arith.constant 0 : index
    %c0_59 = arith.constant 0 : index
    %64 = vector.load %arg5[%c0_58, %c0_59] : memref<128x128xbf16, #tpu.memory_space<vmem>>, vector<128x128xbf16>
    tpu.vector_store %arg5[%c0_58, %c0_59], %63 {strides = array<i32>} : memref<128x128xbf16, #tpu.memory_space<vmem>>, vector<128x128xbf16>,
    %c0_60 = arith.constant 0 : index
    %c0_61 = arith.constant 0 : index
    %65 = vector.load %arg5[%c0_60, %c0_61] : memref<128x128xbf16, #tpu.memory_space<vmem>>, vector<128x128xbf16>
    %c5 = arith.constant 5 : index
    %c0_62 = arith.constant 0 : index
    %c0_63 = arith.constant 0 : index
    %66 = vector.load %arg2[%c5, %c0_62, %c0_63] : memref<12x128x128xbf16, #tpu.memory_space<vmem>>, vector<1x128x128xbf16>
    %67 = vector.shape_cast %66 : vector<1x128x128xbf16> to vector<128x128xbf16>
    %cst_64 = arith.constant dense<0.000000e+00> : vector<128x128xf32>
    %68 = tpu.matmul %65, %67, %cst_64 {dimension_numbers = #tpu.dot_dimension_numbers<[1], [0], [0], [1], [0, 0, 1, 1], [], []>} : vector<128x128xbf16>, vector<128x128xbf16>, vector<128x128xf32> -> vector<128x128xf32>
    %c5_65 = arith.constant 5 : index
    %c0_66 = arith.constant 0 : index
    %c0_67 = arith.constant 0 : index
    %69 = vector.load %arg3[%c5_65, %c0_66, %c0_67] : memref<12x1x128xf32, #tpu.memory_space<vmem>>, vector<1x1x128xf32>
    %70 = vector.shape_cast %69 : vector<1x1x128xf32> to vector<1x128xf32>
    %71 = vector.broadcast %70 : vector<1x128xf32> to vector<128x128xf32>
    %72 = arith.addf %68, %71 : vector<128x128xf32>
    %cst_68 = arith.constant 0.000000e+00 : f32
    %73 = vector.broadcast %cst_68 : f32 to vector<128x128xf32>
    %74 = arith.maximumf %72, %73 : vector<128x128xf32>
    %75 = arith.truncf %74 : vector<128x128xf32> to vector<128x128xbf16>
    %c0_69 = arith.constant 0 : index
    %c0_70 = arith.constant 0 : index
    %76 = vector.load %arg5[%c0_69, %c0_70] : memref<128x128xbf16, #tpu.memory_space<vmem>>, vector<128x128xbf16>
    tpu.vector_store %arg5[%c0_69, %c0_70], %75 {strides = array<i32>} : memref<128x128xbf16, #tpu.memory_space<vmem>>, vector<128x128xbf16>,
    %c0_71 = arith.constant 0 : index
    %c0_72 = arith.constant 0 : index
    %77 = vector.load %arg5[%c0_71, %c0_72] : memref<128x128xbf16, #tpu.memory_space<vmem>>, vector<128x128xbf16>
    %c6 = arith.constant 6 : index
    %c0_73 = arith.constant 0 : index
    %c0_74 = arith.constant 0 : index
    %78 = vector.load %arg2[%c6, %c0_73, %c0_74] : memref<12x128x128xbf16, #tpu.memory_space<vmem>>, vector<1x128x128xbf16>
    %79 = vector.shape_cast %78 : vector<1x128x128xbf16> to vector<128x128xbf16>
    %cst_75 = arith.constant dense<0.000000e+00> : vector<128x128xf32>
    %80 = tpu.matmul %77, %79, %cst_75 {dimension_numbers = #tpu.dot_dimension_numbers<[1], [0], [0], [1], [0, 0, 1, 1], [], []>} : vector<128x128xbf16>, vector<128x128xbf16>, vector<128x128xf32> -> vector<128x128xf32>
    %c6_76 = arith.constant 6 : index
    %c0_77 = arith.constant 0 : index
    %c0_78 = arith.constant 0 : index
    %81 = vector.load %arg3[%c6_76, %c0_77, %c0_78] : memref<12x1x128xf32, #tpu.memory_space<vmem>>, vector<1x1x128xf32>
    %82 = vector.shape_cast %81 : vector<1x1x128xf32> to vector<1x128xf32>
    %83 = vector.broadcast %82 : vector<1x128xf32> to vector<128x128xf32>
    %84 = arith.addf %80, %83 : vector<128x128xf32>
    %cst_79 = arith.constant 0.000000e+00 : f32
    %85 = vector.broadcast %cst_79 : f32 to vector<128x128xf32>
    %86 = arith.maximumf %84, %85 : vector<128x128xf32>
    %87 = arith.truncf %86 : vector<128x128xf32> to vector<128x128xbf16>
    %c0_80 = arith.constant 0 : index
    %c0_81 = arith.constant 0 : index
    %88 = vector.load %arg5[%c0_80, %c0_81] : memref<128x128xbf16, #tpu.memory_space<vmem>>, vector<128x128xbf16>
    tpu.vector_store %arg5[%c0_80, %c0_81], %87 {strides = array<i32>} : memref<128x128xbf16, #tpu.memory_space<vmem>>, vector<128x128xbf16>,
    %c0_82 = arith.constant 0 : index
    %c0_83 = arith.constant 0 : index
    %89 = vector.load %arg5[%c0_82, %c0_83] : memref<128x128xbf16, #tpu.memory_space<vmem>>, vector<128x128xbf16>
    %c7 = arith.constant 7 : index
    %c0_84 = arith.constant 0 : index
    %c0_85 = arith.constant 0 : index
    %90 = vector.load %arg2[%c7, %c0_84, %c0_85] : memref<12x128x128xbf16, #tpu.memory_space<vmem>>, vector<1x128x128xbf16>
    %91 = vector.shape_cast %90 : vector<1x128x128xbf16> to vector<128x128xbf16>
    %cst_86 = arith.constant dense<0.000000e+00> : vector<128x128xf32>
    %92 = tpu.matmul %89, %91, %cst_86 {dimension_numbers = #tpu.dot_dimension_numbers<[1], [0], [0], [1], [0, 0, 1, 1], [], []>} : vector<128x128xbf16>, vector<128x128xbf16>, vector<128x128xf32> -> vector<128x128xf32>
    %c7_87 = arith.constant 7 : index
    %c0_88 = arith.constant 0 : index
    %c0_89 = arith.constant 0 : index
    %93 = vector.load %arg3[%c7_87, %c0_88, %c0_89] : memref<12x1x128xf32, #tpu.memory_space<vmem>>, vector<1x1x128xf32>
    %94 = vector.shape_cast %93 : vector<1x1x128xf32> to vector<1x128xf32>
    %95 = vector.broadcast %94 : vector<1x128xf32> to vector<128x128xf32>
    %96 = arith.addf %92, %95 : vector<128x128xf32>
    %cst_90 = arith.constant 0.000000e+00 : f32
    %97 = vector.broadcast %cst_90 : f32 to vector<128x128xf32>
    %98 = arith.maximumf %96, %97 : vector<128x128xf32>
    %99 = arith.truncf %98 : vector<128x128xf32> to vector<128x128xbf16>
    %c0_91 = arith.constant 0 : index
    %c0_92 = arith.constant 0 : index
    %100 = vector.load %arg5[%c0_91, %c0_92] : memref<128x128xbf16, #tpu.memory_space<vmem>>, vector<128x128xbf16>
    tpu.vector_store %arg5[%c0_91, %c0_92], %99 {strides = array<i32>} : memref<128x128xbf16, #tpu.memory_space<vmem>>, vector<128x128xbf16>,
    %c0_93 = arith.constant 0 : index
    %c0_94 = arith.constant 0 : index
    %101 = vector.load %arg5[%c0_93, %c0_94] : memref<128x128xbf16, #tpu.memory_space<vmem>>, vector<128x128xbf16>
    %c8 = arith.constant 8 : index
    %c0_95 = arith.constant 0 : index
    %c0_96 = arith.constant 0 : index
    %102 = vector.load %arg2[%c8, %c0_95, %c0_96] : memref<12x128x128xbf16, #tpu.memory_space<vmem>>, vector<1x128x128xbf16>
    %103 = vector.shape_cast %102 : vector<1x128x128xbf16> to vector<128x128xbf16>
    %cst_97 = arith.constant dense<0.000000e+00> : vector<128x128xf32>
    %104 = tpu.matmul %101, %103, %cst_97 {dimension_numbers = #tpu.dot_dimension_numbers<[1], [0], [0], [1], [0, 0, 1, 1], [], []>} : vector<128x128xbf16>, vector<128x128xbf16>, vector<128x128xf32> -> vector<128x128xf32>
    %c8_98 = arith.constant 8 : index
    %c0_99 = arith.constant 0 : index
    %c0_100 = arith.constant 0 : index
    %105 = vector.load %arg3[%c8_98, %c0_99, %c0_100] : memref<12x1x128xf32, #tpu.memory_space<vmem>>, vector<1x1x128xf32>
    %106 = vector.shape_cast %105 : vector<1x1x128xf32> to vector<1x128xf32>
    %107 = vector.broadcast %106 : vector<1x128xf32> to vector<128x128xf32>
    %108 = arith.addf %104, %107 : vector<128x128xf32>
    %cst_101 = arith.constant 0.000000e+00 : f32
    %109 = vector.broadcast %cst_101 : f32 to vector<128x128xf32>
    %110 = arith.maximumf %108, %109 : vector<128x128xf32>
    %111 = arith.truncf %110 : vector<128x128xf32> to vector<128x128xbf16>
    %c0_102 = arith.constant 0 : index
    %c0_103 = arith.constant 0 : index
    %112 = vector.load %arg5[%c0_102, %c0_103] : memref<128x128xbf16, #tpu.memory_space<vmem>>, vector<128x128xbf16>
    tpu.vector_store %arg5[%c0_102, %c0_103], %111 {strides = array<i32>} : memref<128x128xbf16, #tpu.memory_space<vmem>>, vector<128x128xbf16>,
    %c0_104 = arith.constant 0 : index
    %c0_105 = arith.constant 0 : index
    %113 = vector.load %arg5[%c0_104, %c0_105] : memref<128x128xbf16, #tpu.memory_space<vmem>>, vector<128x128xbf16>
    %c9 = arith.constant 9 : index
    %c0_106 = arith.constant 0 : index
    %c0_107 = arith.constant 0 : index
    %114 = vector.load %arg2[%c9, %c0_106, %c0_107] : memref<12x128x128xbf16, #tpu.memory_space<vmem>>, vector<1x128x128xbf16>
    %115 = vector.shape_cast %114 : vector<1x128x128xbf16> to vector<128x128xbf16>
    %cst_108 = arith.constant dense<0.000000e+00> : vector<128x128xf32>
    %116 = tpu.matmul %113, %115, %cst_108 {dimension_numbers = #tpu.dot_dimension_numbers<[1], [0], [0], [1], [0, 0, 1, 1], [], []>} : vector<128x128xbf16>, vector<128x128xbf16>, vector<128x128xf32> -> vector<128x128xf32>
    %c9_109 = arith.constant 9 : index
    %c0_110 = arith.constant 0 : index
    %c0_111 = arith.constant 0 : index
    %117 = vector.load %arg3[%c9_109, %c0_110, %c0_111] : memref<12x1x128xf32, #tpu.memory_space<vmem>>, vector<1x1x128xf32>
    %118 = vector.shape_cast %117 : vector<1x1x128xf32> to vector<1x128xf32>
    %119 = vector.broadcast %118 : vector<1x128xf32> to vector<128x128xf32>
    %120 = arith.addf %116, %119 : vector<128x128xf32>
    %cst_112 = arith.constant 0.000000e+00 : f32
    %121 = vector.broadcast %cst_112 : f32 to vector<128x128xf32>
    %122 = arith.maximumf %120, %121 : vector<128x128xf32>
    %123 = arith.truncf %122 : vector<128x128xf32> to vector<128x128xbf16>
    %c0_113 = arith.constant 0 : index
    %c0_114 = arith.constant 0 : index
    %124 = vector.load %arg5[%c0_113, %c0_114] : memref<128x128xbf16, #tpu.memory_space<vmem>>, vector<128x128xbf16>
    tpu.vector_store %arg5[%c0_113, %c0_114], %123 {strides = array<i32>} : memref<128x128xbf16, #tpu.memory_space<vmem>>, vector<128x128xbf16>,
    %c0_115 = arith.constant 0 : index
    %c0_116 = arith.constant 0 : index
    %125 = vector.load %arg5[%c0_115, %c0_116] : memref<128x128xbf16, #tpu.memory_space<vmem>>, vector<128x128xbf16>
    %c10 = arith.constant 10 : index
    %c0_117 = arith.constant 0 : index
    %c0_118 = arith.constant 0 : index
    %126 = vector.load %arg2[%c10, %c0_117, %c0_118] : memref<12x128x128xbf16, #tpu.memory_space<vmem>>, vector<1x128x128xbf16>
    %127 = vector.shape_cast %126 : vector<1x128x128xbf16> to vector<128x128xbf16>
    %cst_119 = arith.constant dense<0.000000e+00> : vector<128x128xf32>
    %128 = tpu.matmul %125, %127, %cst_119 {dimension_numbers = #tpu.dot_dimension_numbers<[1], [0], [0], [1], [0, 0, 1, 1], [], []>} : vector<128x128xbf16>, vector<128x128xbf16>, vector<128x128xf32> -> vector<128x128xf32>
    %c10_120 = arith.constant 10 : index
    %c0_121 = arith.constant 0 : index
    %c0_122 = arith.constant 0 : index
    %129 = vector.load %arg3[%c10_120, %c0_121, %c0_122] : memref<12x1x128xf32, #tpu.memory_space<vmem>>, vector<1x1x128xf32>
    %130 = vector.shape_cast %129 : vector<1x1x128xf32> to vector<1x128xf32>
    %131 = vector.broadcast %130 : vector<1x128xf32> to vector<128x128xf32>
    %132 = arith.addf %128, %131 : vector<128x128xf32>
    %cst_123 = arith.constant 0.000000e+00 : f32
    %133 = vector.broadcast %cst_123 : f32 to vector<128x128xf32>
    %134 = arith.maximumf %132, %133 : vector<128x128xf32>
    %135 = arith.truncf %134 : vector<128x128xf32> to vector<128x128xbf16>
    %c0_124 = arith.constant 0 : index
    %c0_125 = arith.constant 0 : index
    %136 = vector.load %arg5[%c0_124, %c0_125] : memref<128x128xbf16, #tpu.memory_space<vmem>>, vector<128x128xbf16>
    tpu.vector_store %arg5[%c0_124, %c0_125], %135 {strides = array<i32>} : memref<128x128xbf16, #tpu.memory_space<vmem>>, vector<128x128xbf16>,
    %c0_126 = arith.constant 0 : index
    %c0_127 = arith.constant 0 : index
    %137 = vector.load %arg5[%c0_126, %c0_127] : memref<128x128xbf16, #tpu.memory_space<vmem>>, vector<128x128xbf16>
    %c11_128 = arith.constant 11 : index
    %c0_129 = arith.constant 0 : index
    %c0_130 = arith.constant 0 : index
    %138 = vector.load %arg2[%c11_128, %c0_129, %c0_130] : memref<12x128x128xbf16, #tpu.memory_space<vmem>>, vector<1x128x128xbf16>
    %139 = vector.shape_cast %138 : vector<1x128x128xbf16> to vector<128x128xbf16>
    %cst_131 = arith.constant dense<0.000000e+00> : vector<128x128xf32>
    %140 = tpu.matmul %137, %139, %cst_131 {dimension_numbers = #tpu.dot_dimension_numbers<[1], [0], [0], [1], [0, 0, 1, 1], [], []>} : vector<128x128xbf16>, vector<128x128xbf16>, vector<128x128xf32> -> vector<128x128xf32>
    %c11_132 = arith.constant 11 : index
    %c0_133 = arith.constant 0 : index
    %c0_134 = arith.constant 0 : index
    %141 = vector.load %arg3[%c11_132, %c0_133, %c0_134] : memref<12x1x128xf32, #tpu.memory_space<vmem>>, vector<1x1x128xf32>
    %142 = vector.shape_cast %141 : vector<1x1x128xf32> to vector<1x128xf32>
    %143 = vector.broadcast %142 : vector<1x128xf32> to vector<128x128xf32>
    %144 = arith.addf %140, %143 : vector<128x128xf32>
    %cst_135 = arith.constant 0.000000e+00 : f32
    %145 = vector.broadcast %cst_135 : f32 to vector<128x128xf32>
    %146 = arith.maximumf %144, %145 : vector<128x128xf32>
    %147 = arith.truncf %146 : vector<128x128xf32> to vector<128x128xbf16>
    %c0_136 = arith.constant 0 : index
    %c0_137 = arith.constant 0 : index
    %148 = vector.load %arg4[%c0_136, %c0_137] : memref<128x128xbf16, #tpu.memory_space<vmem>>, vector<128x128xbf16>
    tpu.vector_store %arg4[%c0_136, %c0_137], %147 {strides = array<i32>} : memref<128x128xbf16, #tpu.memory_space<vmem>>, vector<128x128xbf16>,
    return
  }
  func.func @transform_0(%arg0: i32) -> (i32, i32) {
    %c0_i32 = arith.constant 0 : i32
    %c0_i32_0 = arith.constant 0 : i32
    return %arg0, %c0_i32 : i32, i32
  }
  func.func @transform_1(%arg0: i32) -> (i32, i32, i32) {
    %c0_i32 = arith.constant 0 : i32
    %c0_i32_0 = arith.constant 0 : i32
    %c0_i32_1 = arith.constant 0 : i32
    %c0_i32_2 = arith.constant 0 : i32
    return %c0_i32, %c0_i32_0, %c0_i32_1 : i32, i32, i32
  }
  func.func @transform_2(%arg0: i32) -> (i32, i32, i32) {
    %c0_i32 = arith.constant 0 : i32
    %c0_i32_0 = arith.constant 0 : i32
    %c0_i32_1 = arith.constant 0 : i32
    %c0_i32_2 = arith.constant 0 : i32
    return %c0_i32, %c0_i32_0, %c0_i32_1 : i32, i32, i32
  }
  func.func @transform_3(%arg0: i32) -> (i32, i32) {
    %c0_i32 = arith.constant 0 : i32
    %c0_i32_0 = arith.constant 0 : i32
    return %arg0, %c0_i32 : i32, i32
  }
}

</mosaic_0001>

<bundles_post_ra>
// kernel: _autoencoder_forward_impl.1
= control target key start
LH: loop header
LB: loop body
LE: loop exit
PB: predicated region body
PF: predicated region fallthrough
CT: control target
= control target key end

     0   :  { %8 = vsyncpa [#allocation4], 0  ;;  %s3851_s12 = smov 0   ;;  %s3994_s0 = inlined_call_operand.vmem [shape: f32[512,11], index: 0, kind: input, shape index: {}]   ;;  %s3995_s1 = inlined_call_operand.hbm [shape: bf16[12,128,128], index: 1, kind: input, shape index: {}]   ;;  %s3996_s2 = inlined_call_operand.vmem [shape: f32[12,1,128], index: 2, kind: input, shape index: {}]   ;;  %s3997_s3 = inlined_call_operand.vmem [shape: bf16[512,128], index: 3, kind: output, shape index: {}]  }
   0x1 LB: > { %s2882_s13 = sadd.s32 4294967295, %s3825_s12   ;;  %p2884_p0 = scmp.ge.s32.totalorder %s3825_s12, 1  ;;  %s3825_s12 = sphi %s3851_s12, %s14_s12  }
   0x2   : > { %p113_p1 = scmp.lt.s32.totalorder %s3825_s12, 5  ;;  %s3827_s14 = smov [#allocation3]  }
   0x3   : > { %s125_s15 = sshll.u32 %s3827_s14, 4  ;;  %p3865_p3 = scmp.eq.s32.totalorder %s2882_s13, 0  ;;  %s126_s15 = int_to_ptr.vmem [resolvable:$true] %s125_s15 }
   0x4   : > { %p3859_p2 = pnand %p2884_p0, %p113_p1  ;;  %s3787_s21 = scalar_lea.hbm %s3995_s1, 12288 }
   0x5   : > { %s4002_s17 = scalar_select %p3865_p3, 1, 0 }
   0x6   : > { %s4001_s16 = scalar_select %p3859_p2, 1, 0 }
   0x7   : > { %p3673_p4 = pneg %p3859_p2  ;;  %p3788_p6 = scmp.ne.s32.totalorder %s3995_s1, %s3787_s21 }
   0x8   : > { %p3794_p10 = scmp.lt.u32.totalorder %s3787_s21, %s3995_s1 }
   0x9   : > { %p3873_p5 = pnand %p3865_p3, %p3673_p4 }
   0xb   : > { %p3789_p7 = pneg %p3873_p5 }
   0xd   : > { %p3790_p8 = pnand %p3789_p7, %p3788_p6 }
   0xf   : > { %p3791_p9 = pneg %p3790_p8 }
  0x11   : > { %p3796_p11 = pnand %p3794_p10, %p3791_p9 }
  0x13   : > { %3799 = shalt.err (!%p3796_p11)
}
  0x14   : > { %s3800_s26 = scalar_lea.vmem %s126_s15, 12288  ;;  %p3808_p1 = scmp.lt.s32.totalorder %s126_s15, %s126_s15 }
  0x15   : > { %p3801_p12 = scmp.ne.s32.totalorder %s126_s15, %s3800_s26  ;;  %p3809_p4 = scmp.lt.s32.totalorder %s3800_s26, %s3800_s26 }
  0x17   : > { %p3803_p13 = pnand %p3801_p12, %p3789_p7  ;;  %p3810_p3 = por %p3809_p4, %p3808_p1 }
  0x19   : > { %p3804_p0 = pneg %p3803_p13 }
  0x1b   : > { %p3811_p2 = pnand %p3810_p3, %p3804_p0 }
  0x1d   : > { %3814 = shalt.err (!%p3811_p2)
}
  0x1e   : > { %s3828_s27 = smov 64   ;;  %s3829_s28 = smov 4  }
  0x1f   : > { %3676 = dma.hbm_to_vmem [thread:$0]  (!%p3873_p5), %s3995_s1, 12288, %s126_s15, [#allocation4], %s3828_s27, %s3828_s27, %s3829_s28  }
  0x20   : > { %p4004_p6 = scmp.ne.s32.totalorder %s4001_s16, 0 }
  0x21   : > { %p4005_p8 = scmp.ne.s32.totalorder (!%p4004_p6), %s4002_s17, 0 }
  0x22   : > { %153 = sbr.rel (%p4004_p6) target bundleno = 2763 (0xacb), region = 32 }
  0x29   : > { %3820 = dma.done.wait (%p4005_p8), [#allocation4], 12288  }
  0x2a   : > { %3822 = vsyncadd (%p4005_p8), [#allocation4], 4294955008  ;;  %s2889_s4 = sshll.u32 %s2882_s13, 4  ;;  %v3691_v0 = vld [vmem:[#allocation3] sm:$0xff]   ;;  %v3692_v1 = vld [vmem:[#allocation3 + $0x8] sm:$0xff]   ;;  %vm214_vm0 = vcmask 89088  }
  0x2b   : > { %p178_p2 = scmp.lt.s32.totalorder %s2889_s4, 63  ;;  %3285 = vmatprep.subr.bf16.mxu0 %v3691_v0  ;;  %v3693_v2 = vld [vmem:[#allocation3 + $0x10] sm:$0xff]   ;;  %v3694_v3 = vld [vmem:[#allocation3 + $0x18] sm:$0xff]   ;;  %vm223_vm1 = vcmask 1047640   ;;  %v3695_v11 = vld [vmem:[#allocation3 + $0x20] sm:$0xff]   ;;  %v3830_v21 = vmov 0  }
  0x2c   : > { %3286 = vmatpush3.bf16.msra.mxu0 %v3691_v0  ;;  %v3699_v30 = vld [vmem:[#allocation3 + $0x40] sm:$0xff]   ;;  %v3700_v31 = vld [vmem:[#allocation3 + $0x48] sm:$0xff]   ;;  %v3701_v33 = vld [vmem:[#allocation3 + $0x50] sm:$0xff]  }
  0x2d   : > { %s4007_s4 = smov (!%p178_p2, %s2889_s4), 63  ;;  %3287 = vmatprep.subr.bf16.mxu0 %v3692_v1  ;;  %v3696_v32 = vld [vmem:[#allocation3 + $0x28] sm:$0xff]   ;;  %3317 = vmatprep.subr.bf16.mxu1 %v3699_v30  ;;  %v3697_v35 = vld [vmem:[#allocation3 + $0x30] sm:$0xff]   ;;  %v3702_v36 = vld [vmem:[#allocation3 + $0x58] sm:$0xff]  }
  0x2e   : > { %s2890_s5 = sshll.u32 %s4007_s4, 3  ;;  %3318 = vmatpush3.bf16.msra.mxu1 %v3699_v30  ;;  %v3698_v37 = vld [vmem:[#allocation3 + $0x38] sm:$0xff]   ;;  %v3703_v45 = vld [vmem:[#allocation3 + $0x60] sm:$0xff]   ;;  %v3704_v46 = vld [vmem:[#allocation3 + $0x68] sm:$0xff]  }
  0x2f   : > { %s3907_s8 = scalar_lea.vmem %s3994_s0, %s2890_s5  ;;  %3319 = vmatprep.subr.bf16.mxu1 %v3700_v31  ;;  %v3705_v47 = vld [vmem:[#allocation3 + $0x70] sm:$0xff]   ;;  %v3706_v48 = vld [vmem:[#allocation3 + $0x78] sm:$0xff]   ;;  %v3707_v49 = vld [vmem:[#allocation3 + $0x80] sm:$0xff]  }
  0x30   : > { %3288 = vmatpush3.bf16.msra.mxu0 %v3692_v1  ;;  %v190_v4 = vld [vmem:[%s3907_s8] sm:$0xff]  ;;  %v191_v5 = vld [vmem:[%s3907_s8 + $0x8] sm:$0xff]  ;;  %v192_v6 = vld [vmem:[%s3907_s8 + $0x10] sm:$0xff] }
  0x31   : > { %3289 = vmatprep.subr.bf16.mxu0 %v3693_v2  ;;  %v206_v7 = vpack.c.bf16 %v191_v5, %v190_v4  ;;  %v193_v8 = vld [vmem:[%s3907_s8 + $0x18] sm:$0xff]  ;;  %v194_v9 = vld [vmem:[%s3907_s8 + $0x20] sm:$0xff]  ;;  %v195_v10 = vld [vmem:[%s3907_s8 + $0x28] sm:$0xff] }
  0x32   : > { %v207_v12 = vpack.c.bf16 %v193_v8, %v192_v6  ;;  %v208_v13 = vpack.c.bf16 %v195_v10, %v194_v9  ;;  %v196_v14 = vld [vmem:[%s3907_s8 + $0x30] sm:$0xff]  ;;  %v197_v15 = vld [vmem:[%s3907_s8 + $0x38] sm:$0xff]  ;;  %v198_v16 = vld [vmem:[%s3907_s8 + $0x40] sm:$0xff]  ;;  %3320 = vmatpush3.bf16.msra.mxu1 %v3700_v31 }
  0x33   : > { %215 = vst.msk [vmem:[#allocation2] sm:$0xff] %vm214_vm0, %v206_v7  ;;  %v209_v17 = vpack.c.bf16 %v197_v15, %v196_v14  ;;  %v199_v18 = vld [vmem:[%s3907_s8 + $0x48] sm:$0xff]  ;;  %v200_v19 = vld [vmem:[%s3907_s8 + $0x50] sm:$0xff]  ;;  %v201_v20 = vld [vmem:[%s3907_s8 + $0x58] sm:$0xff]  ;;  %3321 = vmatprep.subr.bf16.mxu1 %v3701_v33 }
  0x34   : > { %3290 = vmatpush3.bf16.msra.mxu0 %v3693_v2  ;;  %224 = vst.msk [vmem:[#allocation2] sm:$0xff] %vm223_vm1, %v3830_v21  ;;  %v210_v22 = vpack.c.bf16 %v199_v18, %v198_v16  ;;  %v211_v23 = vpack.c.bf16 %v201_v20, %v200_v19  ;;  %v202_v24 = vld [vmem:[%s3907_s8 + $0x60] sm:$0xff]  ;;  %v203_v25 = vld [vmem:[%s3907_s8 + $0x68] sm:$0xff]  ;;  %v204_v26 = vld [vmem:[%s3907_s8 + $0x70] sm:$0xff] }
  0x35   : > { %3291 = vmatprep.subr.bf16.mxu0 %v3694_v3  ;;  %216 = vst.msk [vmem:[#allocation2 + $0x8] sm:$0xff] %vm214_vm0, %v207_v12  ;;  %217 = vst.msk [vmem:[#allocation2 + $0x10] sm:$0xff] %vm214_vm0, %v208_v13  ;;  %v212_v27 = vpack.c.bf16 %v203_v25, %v202_v24  ;;  %v205_v28 = vld [vmem:[%s3907_s8 + $0x78] sm:$0xff]  ;;  %v3708_v50 = vld [vmem:[#allocation3 + $0x88] sm:$0xff]   ;;  %s2892_s8 = sshll.u32 %s4007_s4, 2 }
  0x36   : > { %225 = vst.msk [vmem:[#allocation2 + $0x8] sm:$0xff] %vm223_vm1, %v3830_v21  ;;  %226 = vst.msk [vmem:[#allocation2 + $0x10] sm:$0xff] %vm223_vm1, %v3830_v21  ;;  %v213_v29 = vpack.c.bf16 %v205_v28, %v204_v26  ;;  %3322 = vmatpush3.bf16.msra.mxu1 %v3701_v33  ;;  %v3709_v51 = vld [vmem:[#allocation3 + $0x90] sm:$0xff]   ;;  %v3710_v52 = vld [vmem:[#allocation3 + $0x98] sm:$0xff]   ;;  %s3981_s11 = scalar_lea.vmem %s3997_s3, %s2892_s8 }
  0x37   : > { %218 = vst.msk [vmem:[#allocation2 + $0x18] sm:$0xff] %vm214_vm0, %v209_v17  ;;  %219 = vst.msk [vmem:[#allocation2 + $0x20] sm:$0xff] %vm214_vm0, %v210_v22  ;;  %3323 = vmatprep.subr.bf16.mxu1 %v3702_v36  ;;  %v2893_v53 = vld [vmem:[%s3996_s2] ss:$0 sm:$0xff] }
  0x38   : > { %227 = vst.msk [vmem:[#allocation2 + $0x18] sm:$0xff] %vm223_vm1, %v3830_v21  ;;  %3292 = vmatpush3.bf16.msra.mxu0 %v3694_v3  ;;  %228 = vst.msk [vmem:[#allocation2 + $0x20] sm:$0xff] %vm223_vm1, %v3830_v21 }
  0x39   : > { %220 = vst.msk [vmem:[#allocation2 + $0x28] sm:$0xff] %vm214_vm0, %v211_v23  ;;  %221 = vst.msk [vmem:[#allocation2 + $0x30] sm:$0xff] %vm214_vm0, %v212_v27  ;;  %3293 = vmatprep.subr.bf16.mxu0 %v3695_v11 }
  0x3a   : > { %229 = vst.msk [vmem:[#allocation2 + $0x28] sm:$0xff] %vm223_vm1, %v3830_v21  ;;  %230 = vst.msk [vmem:[#allocation2 + $0x30] sm:$0xff] %vm223_vm1, %v3830_v21  ;;  %3324 = vmatpush3.bf16.msra.mxu1 %v3702_v36 }
  0x3b   : > { %222 = vst.msk [vmem:[#allocation2 + $0x38] sm:$0xff] %vm214_vm0, %v213_v29  ;;  %v232_v34 = vld [vmem:[#allocation2] sm:$0xff]  ;;  %3325 = vmatprep.subr.bf16.mxu1 %v3703_v45 }
  0x3c   : > { %231 = vst.msk [vmem:[#allocation2 + $0x38] sm:$0xff] %vm223_vm1, %v3830_v21  ;;  %3294 = vmatpush3.bf16.msra.mxu0 %v3695_v11  ;;  %3301 = vmatprep.mubr.bf16.mxu0 %v232_v34 }
  0x3d   : > { %3295 = vmatprep.subr.bf16.mxu0 %v3696_v32  ;;  %v233_v38 = vld [vmem:[#allocation2 + $0x8] sm:$0xff]  ;;  %v234_v39 = vld [vmem:[#allocation2 + $0x10] sm:$0xff] }
  0x3e   : > { %3326 = vmatpush3.bf16.msra.mxu1 %v3703_v45 }
  0x3f   : > { %v235_v40 = vld [vmem:[#allocation2 + $0x18] sm:$0xff]  ;;  %v236_v41 = vld [vmem:[#allocation2 + $0x20] sm:$0xff]  ;;  %3327 = vmatprep.subr.bf16.mxu1 %v3704_v46 }
  0x40   : > { %3296 = vmatpush3.bf16.msra.mxu0 %v3696_v32 }
  0x41   : > { %3297 = vmatprep.subr.bf16.mxu0 %v3697_v35  ;;  %v237_v42 = vld [vmem:[#allocation2 + $0x28] sm:$0xff]  ;;  %v238_v43 = vld [vmem:[#allocation2 + $0x30] sm:$0xff] }
  0x42   : > { %3328 = vmatpush3.bf16.msra.mxu1 %v3704_v46  ;;  %v3711_v46 = vld [vmem:[#allocation3 + $0xa0] sm:$0xff]  }
  0x43   : > { %v239_v44 = vld [vmem:[#allocation2 + $0x38] sm:$0xff]  ;;  %3329 = vmatprep.subr.bf16.mxu1 %v3705_v47 }
  0x44   : > { %3298 = vmatpush3.bf16.msra.mxu0 %v3697_v35 }
  0x45   : > { %3299 = vmatprep.subr.bf16.mxu0 %v3698_v37 }
  0x46   : > { %3330 = vmatpush3.bf16.msra.mxu1 %v3705_v47  ;;  %v3712_v47 = vld [vmem:[#allocation3 + $0xa8] sm:$0xff]  }
  0x47   : > { %3331 = vmatprep.subr.bf16.mxu1 %v3706_v48 }
  0x48   : > { %3300 = vmatpush3.bf16.msra.mxu0 %v3698_v37 }
  0x49   : > { %3349 = vmatprep.subr.bf16.mxu0 %v3707_v49 }
  0x4a   : > { %3332 = vmatpush3.bf16.msra.mxu1 %v3706_v48  ;;  %v3713_v48 = vld [vmem:[#allocation3 + $0xb0] sm:$0xff]  }
  0x4b   : > { %3302 = vmatmul.mubr.bf16.vlgmr.msra.gmra.mrb[0].mxu0 %v233_v38 }
  0x4c   : > { %3305 = vmatprep.mubr.bf16.mxu0 %v234_v39  ;;  %3350 = vmatpush3.bf16.msra.mxu0 %v3707_v49  ;;  %v3714_v49 = vld [vmem:[#allocation3 + $0xb8] sm:$0xff]  }
  0x4d   : > { %3351 = vmatprep.subr.bf16.mxu0 %v3708_v50 }
  0x50   : > { %3352 = vmatpush3.bf16.msra.mxu0 %v3708_v50  ;;  %v3715_v50 = vld [vmem:[#allocation3 + $0xc0] sm:$0xff]  }
  0x51   : > { %3353 = vmatprep.subr.bf16.mxu0 %v3709_v51  ;;  %3381 = vmatprep.subr.bf16.mxu1 %v3715_v50 }
  0x53   : > { %3306 = vmatmul.mubr.bf16.gmra.mrb[4].mxu0 %v235_v40 }
  0x54   : > { %3309 = vmatprep.mubr.bf16.mxu0 %v236_v41  ;;  %3354 = vmatpush3.bf16.msra.mxu0 %v3709_v51  ;;  %v3716_v51 = vld [vmem:[#allocation3 + $0xc8] sm:$0xff]  }
  0x55   : > { %3355 = vmatprep.subr.bf16.mxu0 %v3710_v52 }
  0x58   : > { %3356 = vmatpush3.bf16.msra.mxu0 %v3710_v52  ;;  %v3717_v52 = vld [vmem:[#allocation3 + $0xd0] sm:$0xff]  }
  0x59   : > { %3357 = vmatprep.subr.bf16.mxu0 %v3711_v46 }
  0x5b   : > { %3310 = vmatmul.mubr.bf16.gmra.mrb[8].mxu0 %v237_v42 }
  0x5c   : > { %3313 = vmatprep.mubr.bf16.mxu0 %v238_v43  ;;  %3358 = vmatpush3.bf16.msra.mxu0 %v3711_v46 }
  0x5d   : > { %3359 = vmatprep.subr.bf16.mxu0 %v3712_v47 }
  0x60   : > { %3360 = vmatpush3.bf16.msra.mxu0 %v3712_v47  ;;  %v3719_v47 = vld [vmem:[#allocation3 + $0xe0] sm:$0xff]  }
  0x61   : > { %3361 = vmatprep.subr.bf16.mxu0 %v3713_v48 }
  0x63   : > { %3314 = vmatmul.mubr.bf16.gmra.mrb[12].mxu0 %v239_v44 }
  0x64   : > { %3362 = vmatpush3.bf16.msra.mxu0 %v3713_v48  ;;  %v3720_v48 = vld [vmem:[#allocation3 + $0xe8] sm:$0xff]  }
  0x65   : > { %3363 = vmatprep.subr.bf16.mxu0 %v3714_v49 }
  0x68   : > { %3364 = vmatpush3.bf16.msra.mxu0 %v3714_v49  ;;  %v3721_v49 = vld [vmem:[#allocation3 + $0xf0] sm:$0xff]  }
 0x11e   : > { %v3303_v54 = vpop.f32.mrb[0].mxu0 }
 0x11f   : > { %v354_v55 = vadd.f32 %v3303_v54, %v2893_v53  ;;  %v345_v56 = vpop.f32.mrb[1].mxu0  ;;  %v2903_v54 = vld [vmem:[%s3996_s2 + $0x1] ss:$0 sm:$0xff] }
 0x120   : > { %v346_v57 = vadd.f32 %v2893_v53, %v345_v56  ;;  %v3304_v58 = vpop.f32.mrb[2].mxu0 }
 0x121   : > { %v357_v59 = vadd.f32 %v3304_v58, %v2893_v53  ;;  %v348_v60 = vpop.f32.mrb[3].mxu0  ;;  %v410_v62 = vmax.f32 %v354_v55, 0.0 }
 0x122   : > { %v349_v61 = vadd.f32 %v2893_v53, %v348_v60  ;;  %v408_v0 = vmax.f32 %v346_v57, 0.0 }
 0x123   : > { %v411_v63 = vmax.f32 %v357_v59, 0.0 }
 0x124   : > { %v409_v1 = vmax.f32 %v349_v61, 0.0 }
 0x125   : > { %v425_v2 = vpack.c.bf16 %v411_v63, %v410_v62 }
 0x126   : > { %v424_v3 = vpack.c.bf16 %v409_v1, %v408_v0  ;;  %v3307_v4 = vpop.f32.mrb[4].mxu0 }
 0x127   : > { %v370_v5 = vadd.f32 %v3307_v4, %v2893_v53  ;;  %v361_v6 = vpop.f32.mrb[5].mxu0 }
 0x128   : > { %v362_v7 = vadd.f32 %v2893_v53, %v361_v6  ;;  %v3308_v8 = vpop.f32.mrb[6].mxu0  ;;  %3333 = vmatprep.mubr.bf16.mxu1 %v424_v3 }
 0x129   : > { %v373_v9 = vadd.f32 %v3308_v8, %v2893_v53  ;;  %v364_v10 = vpop.f32.mrb[7].mxu0  ;;  %3334 = vmatmul.mubr.bf16.vlgmr.msra.gmra.mrb[0].mxu1 %v425_v2  ;;  %v414_v12 = vmax.f32 %v370_v5, 0.0 }
 0x12a   : > { %v365_v11 = vadd.f32 %v2893_v53, %v364_v10  ;;  %v412_v14 = vmax.f32 %v362_v7, 0.0  ;;  %3382 = vmatpush3.bf16.msra.mxu1 %v3715_v50  ;;  %v3722_v50 = vld [vmem:[#allocation3 + $0xf8] sm:$0xff]  }
 0x12b   : > { %v415_v13 = vmax.f32 %v373_v9, 0.0  ;;  %3383 = vmatprep.subr.bf16.mxu1 %v3716_v51 }
 0x12c   : > { %v413_v15 = vmax.f32 %v365_v11, 0.0 }
 0x12d   : > { %v427_v16 = vpack.c.bf16 %v415_v13, %v414_v12 }
 0x12e   : > { %v426_v17 = vpack.c.bf16 %v413_v15, %v412_v14  ;;  %v3311_v18 = vpop.f32.mrb[8].mxu0  ;;  %3384 = vmatpush3.bf16.msra.mxu1 %v3716_v51  ;;  %v3723_v51 = vld [vmem:[#allocation3 + $0x100] sm:$0xff]  }
 0x12f   : > { %v386_v19 = vadd.f32 %v3311_v18, %v2893_v53  ;;  %v377_v20 = vpop.f32.mrb[9].mxu0  ;;  %3385 = vmatprep.subr.bf16.mxu1 %v3717_v52  ;;  %3413 = vmatprep.subr.bf16.mxu0 %v3723_v51 }
 0x130   : > { %v378_v21 = vadd.f32 %v2893_v53, %v377_v20  ;;  %v3312_v22 = vpop.f32.mrb[10].mxu0  ;;  %3337 = vmatprep.mubr.bf16.mxu1 %v426_v17 }
 0x131   : > { %v389_v23 = vadd.f32 %v3312_v22, %v2893_v53  ;;  %v380_v24 = vpop.f32.mrb[11].mxu0  ;;  %3338 = vmatmul.mubr.bf16.gmra.mrb[4].mxu1 %v427_v16  ;;  %v418_v26 = vmax.f32 %v386_v19, 0.0 }
 0x132   : > { %v381_v25 = vadd.f32 %v2893_v53, %v380_v24  ;;  %v416_v28 = vmax.f32 %v378_v21, 0.0  ;;  %3386 = vmatpush3.bf16.msra.mxu1 %v3717_v52  ;;  %v3724_v52 = vld [vmem:[#allocation3 + $0x108] sm:$0xff]  }
 0x133   : > { %v419_v27 = vmax.f32 %v389_v23, 0.0 }
 0x134   : > { %v417_v29 = vmax.f32 %v381_v25, 0.0 }
 0x135   : > { %v429_v30 = vpack.c.bf16 %v419_v27, %v418_v26 }
 0x136   : > { %v428_v31 = vpack.c.bf16 %v417_v29, %v416_v28  ;;  %v3315_v32 = vpop.f32.mrb[12].mxu0 }
 0x137   : > { %v402_v33 = vadd.f32 %v3315_v32, %v2893_v53  ;;  %v393_v34 = vpop.f32.mrb[13].mxu0 }
 0x138   : > { %v394_v35 = vadd.f32 %v2893_v53, %v393_v34  ;;  %v3316_v36 = vpop.f32.mrb[14].mxu0  ;;  %3341 = vmatprep.mubr.bf16.mxu1 %v428_v31 }
 0x139   : > { %v405_v37 = vadd.f32 %v3316_v36, %v2893_v53  ;;  %v396_v38 = vpop.f32.mrb[15].mxu0  ;;  %3342 = vmatmul.mubr.bf16.gmra.mrb[8].mxu1 %v429_v30  ;;  %v422_v40 = vmax.f32 %v402_v33, 0.0 }
 0x13a   : > { %v397_v39 = vadd.f32 %v2893_v53, %v396_v38  ;;  %v420_v42 = vmax.f32 %v394_v35, 0.0  ;;  %v3718_v53 = vld [vmem:[#allocation3 + $0xd8] sm:$0xff]  }
 0x13b   : > { %v423_v41 = vmax.f32 %v405_v37, 0.0  ;;  %3387 = vmatprep.subr.bf16.mxu1 %v3718_v53 }
 0x13c   : > { %v421_v43 = vmax.f32 %v397_v39, 0.0  ;;  %3388 = vmatpush3.bf16.msra.mxu1 %v3718_v53  ;;  %v3725_v53 = vld [vmem:[#allocation3 + $0x110] sm:$0xff]  }
 0x13d   : > { %v431_v44 = vpack.c.bf16 %v423_v41, %v422_v40  ;;  %3389 = vmatprep.subr.bf16.mxu1 %v3719_v47 }
 0x13e   : > { %v430_v45 = vpack.c.bf16 %v421_v43, %v420_v42 }
 0x140   : > { %3345 = vmatprep.mubr.bf16.mxu1 %v430_v45  ;;  %3390 = vmatpush3.bf16.msra.mxu1 %v3719_v47 }
 0x141   : > { %3346 = vmatmul.mubr.bf16.gmra.mrb[12].mxu1 %v431_v44  ;;  %3391 = vmatprep.subr.bf16.mxu1 %v3720_v48 }
 0x144   : > { %3392 = vmatpush3.bf16.msra.mxu1 %v3720_v48  ;;  %v3727_v48 = vld [vmem:[#allocation3 + $0x120] sm:$0xff]  }
 0x145   : > { %3393 = vmatprep.subr.bf16.mxu1 %v3721_v49 }
 0x148   : > { %3394 = vmatpush3.bf16.msra.mxu1 %v3721_v49  ;;  %v3728_v49 = vld [vmem:[#allocation3 + $0x128] sm:$0xff]  }
 0x149   : > { %3395 = vmatprep.subr.bf16.mxu1 %v3722_v50 }
 0x14c   : > { %3396 = vmatpush3.bf16.msra.mxu1 %v3722_v50  ;;  %v3729_v50 = vld [vmem:[#allocation3 + $0x130] sm:$0xff]  }
 0x1fc   : > { %v3335_v55 = vpop.f32.mrb[0].mxu1 }
 0x1fd   : > { %v564_v56 = vadd.f32 %v3335_v55, %v2903_v54  ;;  %v555_v57 = vpop.f32.mrb[1].mxu1  ;;  %v2913_v55 = vld [vmem:[%s3996_s2 + $0x2] ss:$0 sm:$0xff] }
 0x1fe   : > { %v556_v58 = vadd.f32 %v2903_v54, %v555_v57  ;;  %v3336_v59 = vpop.f32.mrb[2].mxu1 }
 0x1ff   : > { %v567_v60 = vadd.f32 %v3336_v59, %v2903_v54  ;;  %v558_v61 = vpop.f32.mrb[3].mxu1  ;;  %v620_v63 = vmax.f32 %v564_v56, 0.0 }
 0x200   : > { %v559_v62 = vadd.f32 %v2903_v54, %v558_v61  ;;  %v618_v1 = vmax.f32 %v556_v58, 0.0 }
 0x201   : > { %v621_v0 = vmax.f32 %v567_v60, 0.0 }
 0x202   : > { %v619_v2 = vmax.f32 %v559_v62, 0.0 }
 0x203   : > { %v635_v3 = vpack.c.bf16 %v621_v0, %v620_v63 }
 0x204   : > { %v634_v4 = vpack.c.bf16 %v619_v2, %v618_v1  ;;  %v3339_v5 = vpop.f32.mrb[4].mxu1 }
 0x205   : > { %v580_v6 = vadd.f32 %v3339_v5, %v2903_v54  ;;  %v571_v7 = vpop.f32.mrb[5].mxu1 }
 0x206   : > { %v572_v8 = vadd.f32 %v2903_v54, %v571_v7  ;;  %v3340_v9 = vpop.f32.mrb[6].mxu1  ;;  %3365 = vmatprep.mubr.bf16.mxu0 %v634_v4 }
 0x207   : > { %v583_v10 = vadd.f32 %v3340_v9, %v2903_v54  ;;  %v574_v11 = vpop.f32.mrb[7].mxu1  ;;  %3366 = vmatmul.mubr.bf16.vlgmr.msra.gmra.mrb[16].mxu0 %v635_v3  ;;  %v624_v13 = vmax.f32 %v580_v6, 0.0 }
 0x208   : > { %v575_v12 = vadd.f32 %v2903_v54, %v574_v11  ;;  %v622_v15 = vmax.f32 %v572_v8, 0.0  ;;  %3414 = vmatpush3.bf16.msra.mxu0 %v3723_v51  ;;  %v3730_v51 = vld [vmem:[#allocation3 + $0x138] sm:$0xff]  }
 0x209   : > { %v625_v14 = vmax.f32 %v583_v10, 0.0  ;;  %3415 = vmatprep.subr.bf16.mxu0 %v3724_v52 }
 0x20a   : > { %v623_v16 = vmax.f32 %v575_v12, 0.0 }
 0x20b   : > { %v637_v17 = vpack.c.bf16 %v625_v14, %v624_v13 }
 0x20c   : > { %v636_v18 = vpack.c.bf16 %v623_v16, %v622_v15  ;;  %v3343_v19 = vpop.f32.mrb[8].mxu1  ;;  %3416 = vmatpush3.bf16.msra.mxu0 %v3724_v52  ;;  %v3731_v52 = vld [vmem:[#allocation3 + $0x140] sm:$0xff]  }
 0x20d   : > { %v596_v20 = vadd.f32 %v3343_v19, %v2903_v54  ;;  %v587_v21 = vpop.f32.mrb[9].mxu1  ;;  %3417 = vmatprep.subr.bf16.mxu0 %v3725_v53  ;;  %3445 = vmatprep.subr.bf16.mxu1 %v3731_v52 }
 0x20e   : > { %v588_v22 = vadd.f32 %v2903_v54, %v587_v21  ;;  %v3344_v23 = vpop.f32.mrb[10].mxu1  ;;  %3369 = vmatprep.mubr.bf16.mxu0 %v636_v18 }
 0x20f   : > { %v599_v24 = vadd.f32 %v3344_v23, %v2903_v54  ;;  %v590_v25 = vpop.f32.mrb[11].mxu1  ;;  %3370 = vmatmul.mubr.bf16.gmra.mrb[20].mxu0 %v637_v17  ;;  %v628_v27 = vmax.f32 %v596_v20, 0.0 }
 0x210   : > { %v591_v26 = vadd.f32 %v2903_v54, %v590_v25  ;;  %v626_v29 = vmax.f32 %v588_v22, 0.0  ;;  %3418 = vmatpush3.bf16.msra.mxu0 %v3725_v53  ;;  %v3732_v53 = vld [vmem:[#allocation3 + $0x148] sm:$0xff]  }
 0x211   : > { %v629_v28 = vmax.f32 %v599_v24, 0.0 }
 0x212   : > { %v627_v30 = vmax.f32 %v591_v26, 0.0 }
 0x213   : > { %v639_v31 = vpack.c.bf16 %v629_v28, %v628_v27 }
 0x214   : > { %v638_v32 = vpack.c.bf16 %v627_v30, %v626_v29  ;;  %v3347_v33 = vpop.f32.mrb[12].mxu1 }
 0x215   : > { %v612_v34 = vadd.f32 %v3347_v33, %v2903_v54  ;;  %v603_v35 = vpop.f32.mrb[13].mxu1 }
 0x216   : > { %v604_v36 = vadd.f32 %v2903_v54, %v603_v35  ;;  %v3348_v37 = vpop.f32.mrb[14].mxu1  ;;  %3373 = vmatprep.mubr.bf16.mxu0 %v638_v32 }
 0x217   : > { %v615_v38 = vadd.f32 %v3348_v37, %v2903_v54  ;;  %v606_v39 = vpop.f32.mrb[15].mxu1  ;;  %3374 = vmatmul.mubr.bf16.gmra.mrb[24].mxu0 %v639_v31  ;;  %v632_v41 = vmax.f32 %v612_v34, 0.0 }
 0x218   : > { %v607_v40 = vadd.f32 %v2903_v54, %v606_v39  ;;  %v630_v43 = vmax.f32 %v604_v36, 0.0  ;;  %v3726_v54 = vld [vmem:[#allocation3 + $0x118] sm:$0xff]  }
 0x219   : > { %v633_v42 = vmax.f32 %v615_v38, 0.0  ;;  %3419 = vmatprep.subr.bf16.mxu0 %v3726_v54 }
 0x21a   : > { %v631_v44 = vmax.f32 %v607_v40, 0.0  ;;  %3420 = vmatpush3.bf16.msra.mxu0 %v3726_v54  ;;  %v3733_v54 = vld [vmem:[#allocation3 + $0x150] sm:$0xff]  }
 0x21b   : > { %v641_v45 = vpack.c.bf16 %v633_v42, %v632_v41  ;;  %3421 = vmatprep.subr.bf16.mxu0 %v3727_v48 }
 0x21c   : > { %v640_v46 = vpack.c.bf16 %v631_v44, %v630_v43 }
 0x21e   : > { %3377 = vmatprep.mubr.bf16.mxu0 %v640_v46  ;;  %3422 = vmatpush3.bf16.msra.mxu0 %v3727_v48 }
 0x21f   : > { %3378 = vmatmul.mubr.bf16.gmra.mrb[28].mxu0 %v641_v45  ;;  %3423 = vmatprep.subr.bf16.mxu0 %v3728_v49 }
 0x222   : > { %3424 = vmatpush3.bf16.msra.mxu0 %v3728_v49  ;;  %v3735_v49 = vld [vmem:[#allocation3 + $0x160] sm:$0xff]  }
 0x223   : > { %3425 = vmatprep.subr.bf16.mxu0 %v3729_v50 }
 0x226   : > { %3426 = vmatpush3.bf16.msra.mxu0 %v3729_v50  ;;  %v3736_v50 = vld [vmem:[#allocation3 + $0x168] sm:$0xff]  }
 0x227   : > { %3427 = vmatprep.subr.bf16.mxu0 %v3730_v51 }
 0x22a   : > { %3428 = vmatpush3.bf16.msra.mxu0 %v3730_v51  ;;  %v3737_v51 = vld [vmem:[#allocation3 + $0x170] sm:$0xff]  }
 0x2da   : > { %v3367_v56 = vpop.f32.mrb[16].mxu0 }
 0x2db   : > { %v774_v57 = vadd.f32 %v3367_v56, %v2913_v55  ;;  %v765_v58 = vpop.f32.mrb[17].mxu0  ;;  %v2923_v56 = vld [vmem:[%s3996_s2 + $0x3] ss:$0 sm:$0xff] }
 0x2dc   : > { %v766_v59 = vadd.f32 %v2913_v55, %v765_v58  ;;  %v3368_v60 = vpop.f32.mrb[18].mxu0 }
 0x2dd   : > { %v777_v61 = vadd.f32 %v3368_v60, %v2913_v55  ;;  %v768_v62 = vpop.f32.mrb[19].mxu0  ;;  %v830_v0 = vmax.f32 %v774_v57, 0.0 }
 0x2de   : > { %v769_v63 = vadd.f32 %v2913_v55, %v768_v62  ;;  %v828_v2 = vmax.f32 %v766_v59, 0.0 }
 0x2df   : > { %v831_v1 = vmax.f32 %v777_v61, 0.0 }
 0x2e0   : > { %v829_v3 = vmax.f32 %v769_v63, 0.0 }
 0x2e1   : > { %v845_v4 = vpack.c.bf16 %v831_v1, %v830_v0 }
 0x2e2   : > { %v844_v5 = vpack.c.bf16 %v829_v3, %v828_v2  ;;  %v3371_v6 = vpop.f32.mrb[20].mxu0 }
 0x2e3   : > { %v790_v7 = vadd.f32 %v3371_v6, %v2913_v55  ;;  %v781_v8 = vpop.f32.mrb[21].mxu0 }
 0x2e4   : > { %v782_v9 = vadd.f32 %v2913_v55, %v781_v8  ;;  %v3372_v10 = vpop.f32.mrb[22].mxu0  ;;  %3397 = vmatprep.mubr.bf16.mxu1 %v844_v5 }
 0x2e5   : > { %v793_v11 = vadd.f32 %v3372_v10, %v2913_v55  ;;  %v784_v12 = vpop.f32.mrb[23].mxu0  ;;  %3398 = vmatmul.mubr.bf16.vlgmr.msra.gmra.mrb[16].mxu1 %v845_v4  ;;  %v834_v14 = vmax.f32 %v790_v7, 0.0 }
 0x2e6   : > { %v785_v13 = vadd.f32 %v2913_v55, %v784_v12  ;;  %v832_v16 = vmax.f32 %v782_v9, 0.0  ;;  %3446 = vmatpush3.bf16.msra.mxu1 %v3731_v52  ;;  %v3738_v52 = vld [vmem:[#allocation3 + $0x178] sm:$0xff]  }
 0x2e7   : > { %v835_v15 = vmax.f32 %v793_v11, 0.0  ;;  %3447 = vmatprep.subr.bf16.mxu1 %v3732_v53 }
 0x2e8   : > { %v833_v17 = vmax.f32 %v785_v13, 0.0 }
 0x2e9   : > { %v847_v18 = vpack.c.bf16 %v835_v15, %v834_v14 }
 0x2ea   : > { %v846_v19 = vpack.c.bf16 %v833_v17, %v832_v16  ;;  %v3375_v20 = vpop.f32.mrb[24].mxu0  ;;  %3448 = vmatpush3.bf16.msra.mxu1 %v3732_v53  ;;  %v3739_v53 = vld [vmem:[#allocation3 + $0x180] sm:$0xff]  }
 0x2eb   : > { %v806_v21 = vadd.f32 %v3375_v20, %v2913_v55  ;;  %v797_v22 = vpop.f32.mrb[25].mxu0  ;;  %3449 = vmatprep.subr.bf16.mxu1 %v3733_v54  ;;  %3477 = vmatprep.subr.bf16.mxu0 %v3739_v53 }
 0x2ec   : > { %v798_v23 = vadd.f32 %v2913_v55, %v797_v22  ;;  %v3376_v24 = vpop.f32.mrb[26].mxu0  ;;  %3401 = vmatprep.mubr.bf16.mxu1 %v846_v19 }
 0x2ed   : > { %v809_v25 = vadd.f32 %v3376_v24, %v2913_v55  ;;  %v800_v26 = vpop.f32.mrb[27].mxu0  ;;  %3402 = vmatmul.mubr.bf16.gmra.mrb[20].mxu1 %v847_v18  ;;  %v838_v28 = vmax.f32 %v806_v21, 0.0 }
 0x2ee   : > { %v801_v27 = vadd.f32 %v2913_v55, %v800_v26  ;;  %v836_v30 = vmax.f32 %v798_v23, 0.0  ;;  %3450 = vmatpush3.bf16.msra.mxu1 %v3733_v54  ;;  %v3740_v54 = vld [vmem:[#allocation3 + $0x188] sm:$0xff]  }
 0x2ef   : > { %v839_v29 = vmax.f32 %v809_v25, 0.0 }
 0x2f0   : > { %v837_v31 = vmax.f32 %v801_v27, 0.0 }
 0x2f1   : > { %v849_v32 = vpack.c.bf16 %v839_v29, %v838_v28 }
 0x2f2   : > { %v848_v33 = vpack.c.bf16 %v837_v31, %v836_v30  ;;  %v3379_v34 = vpop.f32.mrb[28].mxu0 }
 0x2f3   : > { %v822_v35 = vadd.f32 %v3379_v34, %v2913_v55  ;;  %v813_v36 = vpop.f32.mrb[29].mxu0 }
 0x2f4   : > { %v814_v37 = vadd.f32 %v2913_v55, %v813_v36  ;;  %v3380_v38 = vpop.f32.mrb[30].mxu0  ;;  %3405 = vmatprep.mubr.bf16.mxu1 %v848_v33 }
 0x2f5   : > { %v825_v39 = vadd.f32 %v3380_v38, %v2913_v55  ;;  %v816_v40 = vpop.f32.mrb[31].mxu0  ;;  %3406 = vmatmul.mubr.bf16.gmra.mrb[24].mxu1 %v849_v32  ;;  %v842_v42 = vmax.f32 %v822_v35, 0.0 }
 0x2f6   : > { %v817_v41 = vadd.f32 %v2913_v55, %v816_v40  ;;  %v840_v44 = vmax.f32 %v814_v37, 0.0  ;;  %v3734_v55 = vld [vmem:[#allocation3 + $0x158] sm:$0xff]  }
 0x2f7   : > { %v843_v43 = vmax.f32 %v825_v39, 0.0  ;;  %3451 = vmatprep.subr.bf16.mxu1 %v3734_v55 }
 0x2f8   : > { %v841_v45 = vmax.f32 %v817_v41, 0.0  ;;  %3452 = vmatpush3.bf16.msra.mxu1 %v3734_v55  ;;  %v3741_v55 = vld [vmem:[#allocation3 + $0x190] sm:$0xff]  }
 0x2f9   : > { %v851_v46 = vpack.c.bf16 %v843_v43, %v842_v42  ;;  %3453 = vmatprep.subr.bf16.mxu1 %v3735_v49 }
 0x2fa   : > { %v850_v47 = vpack.c.bf16 %v841_v45, %v840_v44 }
 0x2fc   : > { %3409 = vmatprep.mubr.bf16.mxu1 %v850_v47  ;;  %3454 = vmatpush3.bf16.msra.mxu1 %v3735_v49 }
 0x2fd   : > { %3410 = vmatmul.mubr.bf16.gmra.mrb[28].mxu1 %v851_v46  ;;  %3455 = vmatprep.subr.bf16.mxu1 %v3736_v50 }
 0x300   : > { %3456 = vmatpush3.bf16.msra.mxu1 %v3736_v50  ;;  %v3743_v50 = vld [vmem:[#allocation3 + $0x1a0] sm:$0xff]  }
 0x301   : > { %3457 = vmatprep.subr.bf16.mxu1 %v3737_v51 }
 0x304   : > { %3458 = vmatpush3.bf16.msra.mxu1 %v3737_v51  ;;  %v3744_v51 = vld [vmem:[#allocation3 + $0x1a8] sm:$0xff]  }
 0x305   : > { %3459 = vmatprep.subr.bf16.mxu1 %v3738_v52 }
 0x308   : > { %3460 = vmatpush3.bf16.msra.mxu1 %v3738_v52  ;;  %v3745_v52 = vld [vmem:[#allocation3 + $0x1b0] sm:$0xff]  }
 0x3b8   : > { %v3399_v57 = vpop.f32.mrb[16].mxu1 }
 0x3b9   : > { %v984_v58 = vadd.f32 %v3399_v57, %v2923_v56  ;;  %v975_v59 = vpop.f32.mrb[17].mxu1  ;;  %v2933_v57 = vld [vmem:[%s3996_s2 + $0x4] ss:$0 sm:$0xff] }
 0x3ba   : > { %v976_v60 = vadd.f32 %v2923_v56, %v975_v59  ;;  %v3400_v61 = vpop.f32.mrb[18].mxu1 }
 0x3bb   : > { %v987_v62 = vadd.f32 %v3400_v61, %v2923_v56  ;;  %v978_v63 = vpop.f32.mrb[19].mxu1  ;;  %v1040_v1 = vmax.f32 %v984_v58, 0.0 }
 0x3bc   : > { %v979_v0 = vadd.f32 %v2923_v56, %v978_v63  ;;  %v1038_v3 = vmax.f32 %v976_v60, 0.0 }
 0x3bd   : > { %v1041_v2 = vmax.f32 %v987_v62, 0.0 }
 0x3be   : > { %v1039_v4 = vmax.f32 %v979_v0, 0.0 }
 0x3bf   : > { %v1055_v5 = vpack.c.bf16 %v1041_v2, %v1040_v1 }
 0x3c0   : > { %v1054_v6 = vpack.c.bf16 %v1039_v4, %v1038_v3  ;;  %v3403_v7 = vpop.f32.mrb[20].mxu1 }
 0x3c1   : > { %v1000_v8 = vadd.f32 %v3403_v7, %v2923_v56  ;;  %v991_v9 = vpop.f32.mrb[21].mxu1 }
 0x3c2   : > { %v992_v10 = vadd.f32 %v2923_v56, %v991_v9  ;;  %v3404_v11 = vpop.f32.mrb[22].mxu1  ;;  %3429 = vmatprep.mubr.bf16.mxu0 %v1054_v6 }
 0x3c3   : > { %v1003_v12 = vadd.f32 %v3404_v11, %v2923_v56  ;;  %v994_v13 = vpop.f32.mrb[23].mxu1  ;;  %3430 = vmatmul.mubr.bf16.vlgmr.msra.gmra.mrb[32].mxu0 %v1055_v5  ;;  %v1044_v15 = vmax.f32 %v1000_v8, 0.0 }
 0x3c4   : > { %v995_v14 = vadd.f32 %v2923_v56, %v994_v13  ;;  %v1042_v17 = vmax.f32 %v992_v10, 0.0  ;;  %3478 = vmatpush3.bf16.msra.mxu0 %v3739_v53  ;;  %v3746_v53 = vld [vmem:[#allocation3 + $0x1b8] sm:$0xff]  }
 0x3c5   : > { %v1045_v16 = vmax.f32 %v1003_v12, 0.0  ;;  %3479 = vmatprep.subr.bf16.mxu0 %v3740_v54 }
 0x3c6   : > { %v1043_v18 = vmax.f32 %v995_v14, 0.0 }
 0x3c7   : > { %v1057_v19 = vpack.c.bf16 %v1045_v16, %v1044_v15 }
 0x3c8   : > { %v1056_v20 = vpack.c.bf16 %v1043_v18, %v1042_v17  ;;  %v3407_v21 = vpop.f32.mrb[24].mxu1  ;;  %3480 = vmatpush3.bf16.msra.mxu0 %v3740_v54  ;;  %v3747_v54 = vld [vmem:[#allocation3 + $0x1c0] sm:$0xff]  }
 0x3c9   : > { %v1016_v22 = vadd.f32 %v3407_v21, %v2923_v56  ;;  %v1007_v23 = vpop.f32.mrb[25].mxu1  ;;  %3481 = vmatprep.subr.bf16.mxu0 %v3741_v55  ;;  %3509 = vmatprep.subr.bf16.mxu1 %v3747_v54 }
 0x3ca   : > { %v1008_v24 = vadd.f32 %v2923_v56, %v1007_v23  ;;  %v3408_v25 = vpop.f32.mrb[26].mxu1  ;;  %3433 = vmatprep.mubr.bf16.mxu0 %v1056_v20 }
 0x3cb   : > { %v1019_v26 = vadd.f32 %v3408_v25, %v2923_v56  ;;  %v1010_v27 = vpop.f32.mrb[27].mxu1  ;;  %3434 = vmatmul.mubr.bf16.gmra.mrb[36].mxu0 %v1057_v19  ;;  %v1048_v29 = vmax.f32 %v1016_v22, 0.0 }
 0x3cc   : > { %v1011_v28 = vadd.f32 %v2923_v56, %v1010_v27  ;;  %v1046_v31 = vmax.f32 %v1008_v24, 0.0  ;;  %3482 = vmatpush3.bf16.msra.mxu0 %v3741_v55  ;;  %v3748_v55 = vld [vmem:[#allocation3 + $0x1c8] sm:$0xff]  }
 0x3cd   : > { %v1049_v30 = vmax.f32 %v1019_v26, 0.0 }
 0x3ce   : > { %v1047_v32 = vmax.f32 %v1011_v28, 0.0 }
 0x3cf   : > { %v1059_v33 = vpack.c.bf16 %v1049_v30, %v1048_v29 }
 0x3d0   : > { %v1058_v34 = vpack.c.bf16 %v1047_v32, %v1046_v31  ;;  %v3411_v35 = vpop.f32.mrb[28].mxu1 }
 0x3d1   : > { %v1032_v36 = vadd.f32 %v3411_v35, %v2923_v56  ;;  %v1023_v37 = vpop.f32.mrb[29].mxu1 }
 0x3d2   : > { %v1024_v38 = vadd.f32 %v2923_v56, %v1023_v37  ;;  %v3412_v39 = vpop.f32.mrb[30].mxu1  ;;  %3437 = vmatprep.mubr.bf16.mxu0 %v1058_v34 }
 0x3d3   : > { %v1035_v40 = vadd.f32 %v3412_v39, %v2923_v56  ;;  %v1026_v41 = vpop.f32.mrb[31].mxu1  ;;  %3438 = vmatmul.mubr.bf16.gmra.mrb[40].mxu0 %v1059_v33  ;;  %v1052_v43 = vmax.f32 %v1032_v36, 0.0 }
 0x3d4   : > { %v1027_v42 = vadd.f32 %v2923_v56, %v1026_v41  ;;  %v1050_v45 = vmax.f32 %v1024_v38, 0.0  ;;  %v3742_v56 = vld [vmem:[#allocation3 + $0x198] sm:$0xff]  }
 0x3d5   : > { %v1053_v44 = vmax.f32 %v1035_v40, 0.0  ;;  %3483 = vmatprep.subr.bf16.mxu0 %v3742_v56 }
 0x3d6   : > { %v1051_v46 = vmax.f32 %v1027_v42, 0.0  ;;  %3484 = vmatpush3.bf16.msra.mxu0 %v3742_v56  ;;  %v3749_v56 = vld [vmem:[#allocation3 + $0x1d0] sm:$0xff]  }
 0x3d7   : > { %v1061_v47 = vpack.c.bf16 %v1053_v44, %v1052_v43  ;;  %3485 = vmatprep.subr.bf16.mxu0 %v3743_v50 }
 0x3d8   : > { %v1060_v48 = vpack.c.bf16 %v1051_v46, %v1050_v45 }
 0x3da   : > { %3441 = vmatprep.mubr.bf16.mxu0 %v1060_v48  ;;  %3486 = vmatpush3.bf16.msra.mxu0 %v3743_v50 }
 0x3db   : > { %3442 = vmatmul.mubr.bf16.gmra.mrb[44].mxu0 %v1061_v47  ;;  %3487 = vmatprep.subr.bf16.mxu0 %v3744_v51 }
 0x3de   : > { %3488 = vmatpush3.bf16.msra.mxu0 %v3744_v51  ;;  %v3751_v51 = vld [vmem:[#allocation3 + $0x1e0] sm:$0xff]  }
 0x3df   : > { %3489 = vmatprep.subr.bf16.mxu0 %v3745_v52 }
 0x3e2   : > { %3490 = vmatpush3.bf16.msra.mxu0 %v3745_v52  ;;  %v3752_v52 = vld [vmem:[#allocation3 + $0x1e8] sm:$0xff]  }
 0x3e3   : > { %3491 = vmatprep.subr.bf16.mxu0 %v3746_v53 }
 0x3e6   : > { %3492 = vmatpush3.bf16.msra.mxu0 %v3746_v53  ;;  %v3753_v53 = vld [vmem:[#allocation3 + $0x1f0] sm:$0xff]  }
 0x496   : > { %v3431_v58 = vpop.f32.mrb[32].mxu0 }
 0x497   : > { %v1194_v59 = vadd.f32 %v3431_v58, %v2933_v57  ;;  %v1185_v60 = vpop.f32.mrb[33].mxu0  ;;  %v2943_v58 = vld [vmem:[%s3996_s2 + $0x5] ss:$0 sm:$0xff] }
 0x498   : > { %v1186_v61 = vadd.f32 %v2933_v57, %v1185_v60  ;;  %v3432_v62 = vpop.f32.mrb[34].mxu0 }
 0x499   : > { %v1197_v63 = vadd.f32 %v3432_v62, %v2933_v57  ;;  %v1188_v0 = vpop.f32.mrb[35].mxu0  ;;  %v1250_v2 = vmax.f32 %v1194_v59, 0.0 }
 0x49a   : > { %v1189_v1 = vadd.f32 %v2933_v57, %v1188_v0  ;;  %v1248_v4 = vmax.f32 %v1186_v61, 0.0 }
 0x49b   : > { %v1251_v3 = vmax.f32 %v1197_v63, 0.0 }
 0x49c   : > { %v1249_v5 = vmax.f32 %v1189_v1, 0.0 }
 0x49d   : > { %v1265_v6 = vpack.c.bf16 %v1251_v3, %v1250_v2 }
 0x49e   : > { %v1264_v7 = vpack.c.bf16 %v1249_v5, %v1248_v4  ;;  %v3435_v8 = vpop.f32.mrb[36].mxu0 }
 0x49f   : > { %v1210_v9 = vadd.f32 %v3435_v8, %v2933_v57  ;;  %v1201_v10 = vpop.f32.mrb[37].mxu0 }
 0x4a0   : > { %v1202_v11 = vadd.f32 %v2933_v57, %v1201_v10  ;;  %v3436_v12 = vpop.f32.mrb[38].mxu0  ;;  %3461 = vmatprep.mubr.bf16.mxu1 %v1264_v7 }
 0x4a1   : > { %v1213_v13 = vadd.f32 %v3436_v12, %v2933_v57  ;;  %v1204_v14 = vpop.f32.mrb[39].mxu0  ;;  %3462 = vmatmul.mubr.bf16.vlgmr.msra.gmra.mrb[32].mxu1 %v1265_v6  ;;  %v1254_v16 = vmax.f32 %v1210_v9, 0.0 }
 0x4a2   : > { %v1205_v15 = vadd.f32 %v2933_v57, %v1204_v14  ;;  %v1252_v18 = vmax.f32 %v1202_v11, 0.0  ;;  %3510 = vmatpush3.bf16.msra.mxu1 %v3747_v54  ;;  %v3754_v54 = vld [vmem:[#allocation3 + $0x1f8] sm:$0xff]  }
 0x4a3   : > { %v1255_v17 = vmax.f32 %v1213_v13, 0.0  ;;  %3511 = vmatprep.subr.bf16.mxu1 %v3748_v55 }
 0x4a4   : > { %v1253_v19 = vmax.f32 %v1205_v15, 0.0 }
 0x4a5   : > { %v1267_v20 = vpack.c.bf16 %v1255_v17, %v1254_v16 }
 0x4a6   : > { %v1266_v21 = vpack.c.bf16 %v1253_v19, %v1252_v18  ;;  %v3439_v22 = vpop.f32.mrb[40].mxu0  ;;  %3512 = vmatpush3.bf16.msra.mxu1 %v3748_v55  ;;  %v3755_v55 = vld [vmem:[#allocation3 + $0x200] sm:$0xff]  }
 0x4a7   : > { %v1226_v23 = vadd.f32 %v3439_v22, %v2933_v57  ;;  %v1217_v24 = vpop.f32.mrb[41].mxu0  ;;  %3513 = vmatprep.subr.bf16.mxu1 %v3749_v56  ;;  %3541 = vmatprep.subr.bf16.mxu0 %v3755_v55 }
 0x4a8   : > { %v1218_v25 = vadd.f32 %v2933_v57, %v1217_v24  ;;  %v3440_v26 = vpop.f32.mrb[42].mxu0  ;;  %3465 = vmatprep.mubr.bf16.mxu1 %v1266_v21 }
 0x4a9   : > { %v1229_v27 = vadd.f32 %v3440_v26, %v2933_v57  ;;  %v1220_v28 = vpop.f32.mrb[43].mxu0  ;;  %3466 = vmatmul.mubr.bf16.gmra.mrb[36].mxu1 %v1267_v20  ;;  %v1258_v30 = vmax.f32 %v1226_v23, 0.0 }
 0x4aa   : > { %v1221_v29 = vadd.f32 %v2933_v57, %v1220_v28  ;;  %v1256_v32 = vmax.f32 %v1218_v25, 0.0  ;;  %3514 = vmatpush3.bf16.msra.mxu1 %v3749_v56  ;;  %v3756_v56 = vld [vmem:[#allocation3 + $0x208] sm:$0xff]  }
 0x4ab   : > { %v1259_v31 = vmax.f32 %v1229_v27, 0.0 }
 0x4ac   : > { %v1257_v33 = vmax.f32 %v1221_v29, 0.0 }
 0x4ad   : > { %v1269_v34 = vpack.c.bf16 %v1259_v31, %v1258_v30 }
 0x4ae   : > { %v1268_v35 = vpack.c.bf16 %v1257_v33, %v1256_v32  ;;  %v3443_v36 = vpop.f32.mrb[44].mxu0 }
 0x4af   : > { %v1242_v37 = vadd.f32 %v3443_v36, %v2933_v57  ;;  %v1233_v38 = vpop.f32.mrb[45].mxu0 }
 0x4b0   : > { %v1234_v39 = vadd.f32 %v2933_v57, %v1233_v38  ;;  %v3444_v40 = vpop.f32.mrb[46].mxu0  ;;  %3469 = vmatprep.mubr.bf16.mxu1 %v1268_v35 }
 0x4b1   : > { %v1245_v41 = vadd.f32 %v3444_v40, %v2933_v57  ;;  %v1236_v42 = vpop.f32.mrb[47].mxu0  ;;  %3470 = vmatmul.mubr.bf16.gmra.mrb[40].mxu1 %v1269_v34  ;;  %v1262_v44 = vmax.f32 %v1242_v37, 0.0 }
 0x4b2   : > { %v1237_v43 = vadd.f32 %v2933_v57, %v1236_v42  ;;  %v1260_v46 = vmax.f32 %v1234_v39, 0.0  ;;  %v3750_v57 = vld [vmem:[#allocation3 + $0x1d8] sm:$0xff]  }
 0x4b3   : > { %v1263_v45 = vmax.f32 %v1245_v41, 0.0  ;;  %3515 = vmatprep.subr.bf16.mxu1 %v3750_v57 }
 0x4b4   : > { %v1261_v47 = vmax.f32 %v1237_v43, 0.0  ;;  %3516 = vmatpush3.bf16.msra.mxu1 %v3750_v57  ;;  %v3757_v57 = vld [vmem:[#allocation3 + $0x210] sm:$0xff]  }
 0x4b5   : > { %v1271_v48 = vpack.c.bf16 %v1263_v45, %v1262_v44  ;;  %3517 = vmatprep.subr.bf16.mxu1 %v3751_v51 }
 0x4b6   : > { %v1270_v49 = vpack.c.bf16 %v1261_v47, %v1260_v46 }
 0x4b8   : > { %3473 = vmatprep.mubr.bf16.mxu1 %v1270_v49  ;;  %3518 = vmatpush3.bf16.msra.mxu1 %v3751_v51 }
 0x4b9   : > { %3474 = vmatmul.mubr.bf16.gmra.mrb[44].mxu1 %v1271_v48  ;;  %3519 = vmatprep.subr.bf16.mxu1 %v3752_v52 }
 0x4bc   : > { %3520 = vmatpush3.bf16.msra.mxu1 %v3752_v52  ;;  %v3759_v52 = vld [vmem:[#allocation3 + $0x220] sm:$0xff]  }
 0x4bd   : > { %3521 = vmatprep.subr.bf16.mxu1 %v3753_v53 }
 0x4c0   : > { %3522 = vmatpush3.bf16.msra.mxu1 %v3753_v53  ;;  %v3760_v53 = vld [vmem:[#allocation3 + $0x228] sm:$0xff]  }
 0x4c1   : > { %3523 = vmatprep.subr.bf16.mxu1 %v3754_v54 }
 0x4c4   : > { %3524 = vmatpush3.bf16.msra.mxu1 %v3754_v54  ;;  %v3761_v54 = vld [vmem:[#allocation3 + $0x230] sm:$0xff]  }
 0x574   : > { %v3463_v59 = vpop.f32.mrb[32].mxu1 }
 0x575   : > { %v1404_v60 = vadd.f32 %v3463_v59, %v2943_v58  ;;  %v1395_v61 = vpop.f32.mrb[33].mxu1  ;;  %v2953_v59 = vld [vmem:[%s3996_s2 + $0x6] ss:$0 sm:$0xff] }
 0x576   : > { %v1396_v62 = vadd.f32 %v2943_v58, %v1395_v61  ;;  %v3464_v63 = vpop.f32.mrb[34].mxu1 }
 0x577   : > { %v1407_v0 = vadd.f32 %v3464_v63, %v2943_v58  ;;  %v1398_v1 = vpop.f32.mrb[35].mxu1  ;;  %v1460_v3 = vmax.f32 %v1404_v60, 0.0 }
 0x578   : > { %v1399_v2 = vadd.f32 %v2943_v58, %v1398_v1  ;;  %v1458_v5 = vmax.f32 %v1396_v62, 0.0 }
 0x579   : > { %v1461_v4 = vmax.f32 %v1407_v0, 0.0 }
 0x57a   : > { %v1459_v6 = vmax.f32 %v1399_v2, 0.0 }
 0x57b   : > { %v1475_v7 = vpack.c.bf16 %v1461_v4, %v1460_v3 }
 0x57c   : > { %v1474_v8 = vpack.c.bf16 %v1459_v6, %v1458_v5  ;;  %v3467_v9 = vpop.f32.mrb[36].mxu1 }
 0x57d   : > { %v1420_v10 = vadd.f32 %v3467_v9, %v2943_v58  ;;  %v1411_v11 = vpop.f32.mrb[37].mxu1 }
 0x57e   : > { %v1412_v12 = vadd.f32 %v2943_v58, %v1411_v11  ;;  %v3468_v13 = vpop.f32.mrb[38].mxu1  ;;  %3493 = vmatprep.mubr.bf16.mxu0 %v1474_v8 }
 0x57f   : > { %v1423_v14 = vadd.f32 %v3468_v13, %v2943_v58  ;;  %v1414_v15 = vpop.f32.mrb[39].mxu1  ;;  %3494 = vmatmul.mubr.bf16.vlgmr.msra.gmra.mrb[48].mxu0 %v1475_v7  ;;  %v1464_v17 = vmax.f32 %v1420_v10, 0.0 }
 0x580   : > { %v1415_v16 = vadd.f32 %v2943_v58, %v1414_v15  ;;  %v1462_v19 = vmax.f32 %v1412_v12, 0.0  ;;  %3542 = vmatpush3.bf16.msra.mxu0 %v3755_v55  ;;  %v3762_v55 = vld [vmem:[#allocation3 + $0x238] sm:$0xff]  }
 0x581   : > { %v1465_v18 = vmax.f32 %v1423_v14, 0.0  ;;  %3543 = vmatprep.subr.bf16.mxu0 %v3756_v56 }
 0x582   : > { %v1463_v20 = vmax.f32 %v1415_v16, 0.0 }
 0x583   : > { %v1477_v21 = vpack.c.bf16 %v1465_v18, %v1464_v17 }
 0x584   : > { %v1476_v22 = vpack.c.bf16 %v1463_v20, %v1462_v19  ;;  %v3471_v23 = vpop.f32.mrb[40].mxu1  ;;  %3544 = vmatpush3.bf16.msra.mxu0 %v3756_v56  ;;  %v3763_v56 = vld [vmem:[#allocation3 + $0x240] sm:$0xff]  }
 0x585   : > { %v1436_v24 = vadd.f32 %v3471_v23, %v2943_v58  ;;  %v1427_v25 = vpop.f32.mrb[41].mxu1  ;;  %3545 = vmatprep.subr.bf16.mxu0 %v3757_v57  ;;  %3573 = vmatprep.subr.bf16.mxu1 %v3763_v56 }
 0x586   : > { %v1428_v26 = vadd.f32 %v2943_v58, %v1427_v25  ;;  %v3472_v27 = vpop.f32.mrb[42].mxu1  ;;  %3497 = vmatprep.mubr.bf16.mxu0 %v1476_v22 }
 0x587   : > { %v1439_v28 = vadd.f32 %v3472_v27, %v2943_v58  ;;  %v1430_v29 = vpop.f32.mrb[43].mxu1  ;;  %3498 = vmatmul.mubr.bf16.gmra.mrb[52].mxu0 %v1477_v21  ;;  %v1468_v31 = vmax.f32 %v1436_v24, 0.0 }
 0x588   : > { %v1431_v30 = vadd.f32 %v2943_v58, %v1430_v29  ;;  %v1466_v33 = vmax.f32 %v1428_v26, 0.0  ;;  %3546 = vmatpush3.bf16.msra.mxu0 %v3757_v57  ;;  %v3764_v57 = vld [vmem:[#allocation3 + $0x248] sm:$0xff]  }
 0x589   : > { %v1469_v32 = vmax.f32 %v1439_v28, 0.0 }
 0x58a   : > { %v1467_v34 = vmax.f32 %v1431_v30, 0.0 }
 0x58b   : > { %v1479_v35 = vpack.c.bf16 %v1469_v32, %v1468_v31 }
 0x58c   : > { %v1478_v36 = vpack.c.bf16 %v1467_v34, %v1466_v33  ;;  %v3475_v37 = vpop.f32.mrb[44].mxu1 }
 0x58d   : > { %v1452_v38 = vadd.f32 %v3475_v37, %v2943_v58  ;;  %v1443_v39 = vpop.f32.mrb[45].mxu1 }
 0x58e   : > { %v1444_v40 = vadd.f32 %v2943_v58, %v1443_v39  ;;  %v3476_v41 = vpop.f32.mrb[46].mxu1  ;;  %3501 = vmatprep.mubr.bf16.mxu0 %v1478_v36 }
 0x58f   : > { %v1455_v42 = vadd.f32 %v3476_v41, %v2943_v58  ;;  %v1446_v43 = vpop.f32.mrb[47].mxu1  ;;  %3502 = vmatmul.mubr.bf16.gmra.mrb[56].mxu0 %v1479_v35  ;;  %v1472_v45 = vmax.f32 %v1452_v38, 0.0 }
 0x590   : > { %v1447_v44 = vadd.f32 %v2943_v58, %v1446_v43  ;;  %v1470_v47 = vmax.f32 %v1444_v40, 0.0  ;;  %v3758_v58 = vld [vmem:[#allocation3 + $0x218] sm:$0xff]  }
 0x591   : > { %v1473_v46 = vmax.f32 %v1455_v42, 0.0  ;;  %3547 = vmatprep.subr.bf16.mxu0 %v3758_v58 }
 0x592   : > { %v1471_v48 = vmax.f32 %v1447_v44, 0.0  ;;  %3548 = vmatpush3.bf16.msra.mxu0 %v3758_v58  ;;  %v3765_v58 = vld [vmem:[#allocation3 + $0x250] sm:$0xff]  }
 0x593   : > { %v1481_v49 = vpack.c.bf16 %v1473_v46, %v1472_v45  ;;  %3549 = vmatprep.subr.bf16.mxu0 %v3759_v52 }
 0x594   : > { %v1480_v50 = vpack.c.bf16 %v1471_v48, %v1470_v47 }
 0x596   : > { %3505 = vmatprep.mubr.bf16.mxu0 %v1480_v50  ;;  %3550 = vmatpush3.bf16.msra.mxu0 %v3759_v52 }
 0x597   : > { %3506 = vmatmul.mubr.bf16.gmra.mrb[60].mxu0 %v1481_v49  ;;  %3551 = vmatprep.subr.bf16.mxu0 %v3760_v53 }
 0x59a   : > { %3552 = vmatpush3.bf16.msra.mxu0 %v3760_v53  ;;  %v3767_v53 = vld [vmem:[#allocation3 + $0x260] sm:$0xff]  }
 0x59b   : > { %3553 = vmatprep.subr.bf16.mxu0 %v3761_v54 }
 0x59e   : > { %3554 = vmatpush3.bf16.msra.mxu0 %v3761_v54  ;;  %v3768_v54 = vld [vmem:[#allocation3 + $0x268] sm:$0xff]  }
 0x59f   : > { %3555 = vmatprep.subr.bf16.mxu0 %v3762_v55 }
 0x5a2   : > { %3556 = vmatpush3.bf16.msra.mxu0 %v3762_v55  ;;  %v3769_v55 = vld [vmem:[#allocation3 + $0x270] sm:$0xff]  }
 0x652   : > { %v3495_v60 = vpop.f32.mrb[48].mxu0 }
 0x653   : > { %v1614_v61 = vadd.f32 %v3495_v60, %v2953_v59  ;;  %v1605_v62 = vpop.f32.mrb[49].mxu0  ;;  %v2963_v60 = vld [vmem:[%s3996_s2 + $0x7] ss:$0 sm:$0xff] }
 0x654   : > { %v1606_v63 = vadd.f32 %v2953_v59, %v1605_v62  ;;  %v3496_v0 = vpop.f32.mrb[50].mxu0 }
 0x655   : > { %v1617_v1 = vadd.f32 %v3496_v0, %v2953_v59  ;;  %v1608_v2 = vpop.f32.mrb[51].mxu0  ;;  %v1670_v4 = vmax.f32 %v1614_v61, 0.0 }
 0x656   : > { %v1609_v3 = vadd.f32 %v2953_v59, %v1608_v2  ;;  %v1668_v6 = vmax.f32 %v1606_v63, 0.0 }
 0x657   : > { %v1671_v5 = vmax.f32 %v1617_v1, 0.0 }
 0x658   : > { %v1669_v7 = vmax.f32 %v1609_v3, 0.0 }
 0x659   : > { %v1685_v8 = vpack.c.bf16 %v1671_v5, %v1670_v4 }
 0x65a   : > { %v1684_v9 = vpack.c.bf16 %v1669_v7, %v1668_v6  ;;  %v3499_v10 = vpop.f32.mrb[52].mxu0 }
 0x65b   : > { %v1630_v11 = vadd.f32 %v3499_v10, %v2953_v59  ;;  %v1621_v12 = vpop.f32.mrb[53].mxu0 }
 0x65c   : > { %v1622_v13 = vadd.f32 %v2953_v59, %v1621_v12  ;;  %v3500_v14 = vpop.f32.mrb[54].mxu0  ;;  %3525 = vmatprep.mubr.bf16.mxu1 %v1684_v9 }
 0x65d   : > { %v1633_v15 = vadd.f32 %v3500_v14, %v2953_v59  ;;  %v1624_v16 = vpop.f32.mrb[55].mxu0  ;;  %3526 = vmatmul.mubr.bf16.vlgmr.msra.gmra.mrb[48].mxu1 %v1685_v8  ;;  %v1674_v18 = vmax.f32 %v1630_v11, 0.0 }
 0x65e   : > { %v1625_v17 = vadd.f32 %v2953_v59, %v1624_v16  ;;  %v1672_v20 = vmax.f32 %v1622_v13, 0.0  ;;  %3574 = vmatpush3.bf16.msra.mxu1 %v3763_v56  ;;  %v3770_v56 = vld [vmem:[#allocation3 + $0x278] sm:$0xff]  }
 0x65f   : > { %v1675_v19 = vmax.f32 %v1633_v15, 0.0  ;;  %3575 = vmatprep.subr.bf16.mxu1 %v3764_v57 }
 0x660   : > { %v1673_v21 = vmax.f32 %v1625_v17, 0.0 }
 0x661   : > { %v1687_v22 = vpack.c.bf16 %v1675_v19, %v1674_v18 }
 0x662   : > { %v1686_v23 = vpack.c.bf16 %v1673_v21, %v1672_v20  ;;  %v3503_v24 = vpop.f32.mrb[56].mxu0  ;;  %3576 = vmatpush3.bf16.msra.mxu1 %v3764_v57  ;;  %v3771_v57 = vld [vmem:[#allocation3 + $0x280] sm:$0xff]  }
 0x663   : > { %v1646_v25 = vadd.f32 %v3503_v24, %v2953_v59  ;;  %v1637_v26 = vpop.f32.mrb[57].mxu0  ;;  %3577 = vmatprep.subr.bf16.mxu1 %v3765_v58  ;;  %3605 = vmatprep.subr.bf16.mxu0 %v3771_v57 }
 0x664   : > { %v1638_v27 = vadd.f32 %v2953_v59, %v1637_v26  ;;  %v3504_v28 = vpop.f32.mrb[58].mxu0  ;;  %3529 = vmatprep.mubr.bf16.mxu1 %v1686_v23 }
 0x665   : > { %v1649_v29 = vadd.f32 %v3504_v28, %v2953_v59  ;;  %v1640_v30 = vpop.f32.mrb[59].mxu0  ;;  %3530 = vmatmul.mubr.bf16.gmra.mrb[52].mxu1 %v1687_v22  ;;  %v1678_v32 = vmax.f32 %v1646_v25, 0.0 }
 0x666   : > { %v1641_v31 = vadd.f32 %v2953_v59, %v1640_v30  ;;  %v1676_v34 = vmax.f32 %v1638_v27, 0.0  ;;  %3578 = vmatpush3.bf16.msra.mxu1 %v3765_v58  ;;  %v3772_v58 = vld [vmem:[#allocation3 + $0x288] sm:$0xff]  }
 0x667   : > { %v1679_v33 = vmax.f32 %v1649_v29, 0.0 }
 0x668   : > { %v1677_v35 = vmax.f32 %v1641_v31, 0.0 }
 0x669   : > { %v1689_v36 = vpack.c.bf16 %v1679_v33, %v1678_v32 }
 0x66a   : > { %v1688_v37 = vpack.c.bf16 %v1677_v35, %v1676_v34  ;;  %v3507_v38 = vpop.f32.mrb[60].mxu0 }
 0x66b   : > { %v1662_v39 = vadd.f32 %v3507_v38, %v2953_v59  ;;  %v1653_v40 = vpop.f32.mrb[61].mxu0 }
 0x66c   : > { %v1654_v41 = vadd.f32 %v2953_v59, %v1653_v40  ;;  %v3508_v42 = vpop.f32.mrb[62].mxu0  ;;  %3533 = vmatprep.mubr.bf16.mxu1 %v1688_v37 }
 0x66d   : > { %v1665_v43 = vadd.f32 %v3508_v42, %v2953_v59  ;;  %v1656_v44 = vpop.f32.mrb[63].mxu0  ;;  %3534 = vmatmul.mubr.bf16.gmra.mrb[56].mxu1 %v1689_v36  ;;  %v1682_v46 = vmax.f32 %v1662_v39, 0.0 }
 0x66e   : > { %v1657_v45 = vadd.f32 %v2953_v59, %v1656_v44  ;;  %v1680_v48 = vmax.f32 %v1654_v41, 0.0  ;;  %v3766_v59 = vld [vmem:[#allocation3 + $0x258] sm:$0xff]  }
 0x66f   : > { %v1683_v47 = vmax.f32 %v1665_v43, 0.0  ;;  %3579 = vmatprep.subr.bf16.mxu1 %v3766_v59 }
 0x670   : > { %v1681_v49 = vmax.f32 %v1657_v45, 0.0  ;;  %3580 = vmatpush3.bf16.msra.mxu1 %v3766_v59  ;;  %v3773_v59 = vld [vmem:[#allocation3 + $0x290] sm:$0xff]  }
 0x671   : > { %v1691_v50 = vpack.c.bf16 %v1683_v47, %v1682_v46  ;;  %3581 = vmatprep.subr.bf16.mxu1 %v3767_v53 }
 0x672   : > { %v1690_v51 = vpack.c.bf16 %v1681_v49, %v1680_v48 }
 0x674   : > { %3537 = vmatprep.mubr.bf16.mxu1 %v1690_v51  ;;  %3582 = vmatpush3.bf16.msra.mxu1 %v3767_v53 }
 0x675   : > { %3538 = vmatmul.mubr.bf16.gmra.mrb[60].mxu1 %v1691_v50  ;;  %3583 = vmatprep.subr.bf16.mxu1 %v3768_v54 }
 0x678   : > { %3584 = vmatpush3.bf16.msra.mxu1 %v3768_v54  ;;  %v3775_v54 = vld [vmem:[#allocation3 + $0x2a0] sm:$0xff]  }
 0x679   : > { %3585 = vmatprep.subr.bf16.mxu1 %v3769_v55 }
 0x67c   : > { %3586 = vmatpush3.bf16.msra.mxu1 %v3769_v55  ;;  %v3776_v55 = vld [vmem:[#allocation3 + $0x2a8] sm:$0xff]  }
 0x67d   : > { %3587 = vmatprep.subr.bf16.mxu1 %v3770_v56 }
 0x680   : > { %3588 = vmatpush3.bf16.msra.mxu1 %v3770_v56  ;;  %v3777_v56 = vld [vmem:[#allocation3 + $0x2b0] sm:$0xff]  }
 0x730   : > { %v3527_v61 = vpop.f32.mrb[48].mxu1 }
 0x731   : > { %v1824_v62 = vadd.f32 %v3527_v61, %v2963_v60  ;;  %v1815_v63 = vpop.f32.mrb[49].mxu1  ;;  %v2973_v61 = vld [vmem:[%s3996_s2 + $0x8] ss:$0 sm:$0xff] }
 0x732   : > { %v1816_v0 = vadd.f32 %v2963_v60, %v1815_v63  ;;  %v3528_v1 = vpop.f32.mrb[50].mxu1 }
 0x733   : > { %v1827_v2 = vadd.f32 %v3528_v1, %v2963_v60  ;;  %v1818_v3 = vpop.f32.mrb[51].mxu1  ;;  %v1880_v5 = vmax.f32 %v1824_v62, 0.0 }
 0x734   : > { %v1819_v4 = vadd.f32 %v2963_v60, %v1818_v3  ;;  %v1878_v7 = vmax.f32 %v1816_v0, 0.0 }
 0x735   : > { %v1881_v6 = vmax.f32 %v1827_v2, 0.0 }
 0x736   : > { %v1879_v8 = vmax.f32 %v1819_v4, 0.0 }
 0x737   : > { %v1895_v9 = vpack.c.bf16 %v1881_v6, %v1880_v5 }
 0x738   : > { %v1894_v10 = vpack.c.bf16 %v1879_v8, %v1878_v7  ;;  %v3531_v11 = vpop.f32.mrb[52].mxu1 }
 0x739   : > { %v1840_v12 = vadd.f32 %v3531_v11, %v2963_v60  ;;  %v1831_v13 = vpop.f32.mrb[53].mxu1 }
 0x73a   : > { %v1832_v14 = vadd.f32 %v2963_v60, %v1831_v13  ;;  %v3532_v15 = vpop.f32.mrb[54].mxu1  ;;  %3557 = vmatprep.mubr.bf16.mxu0 %v1894_v10 }
 0x73b   : > { %v1843_v16 = vadd.f32 %v3532_v15, %v2963_v60  ;;  %v1834_v17 = vpop.f32.mrb[55].mxu1  ;;  %3558 = vmatmul.mubr.bf16.vlgmr.msra.gmra.mrb[64].mxu0 %v1895_v9  ;;  %v1884_v19 = vmax.f32 %v1840_v12, 0.0 }
 0x73c   : > { %v1835_v18 = vadd.f32 %v2963_v60, %v1834_v17  ;;  %v1882_v21 = vmax.f32 %v1832_v14, 0.0  ;;  %3606 = vmatpush3.bf16.msra.mxu0 %v3771_v57  ;;  %v3778_v57 = vld [vmem:[#allocation3 + $0x2b8] sm:$0xff]  }
 0x73d   : > { %v1885_v20 = vmax.f32 %v1843_v16, 0.0  ;;  %3607 = vmatprep.subr.bf16.mxu0 %v3772_v58 }
 0x73e   : > { %v1883_v22 = vmax.f32 %v1835_v18, 0.0 }
 0x73f   : > { %v1897_v23 = vpack.c.bf16 %v1885_v20, %v1884_v19 }
 0x740   : > { %v1896_v24 = vpack.c.bf16 %v1883_v22, %v1882_v21  ;;  %v3535_v25 = vpop.f32.mrb[56].mxu1  ;;  %3608 = vmatpush3.bf16.msra.mxu0 %v3772_v58  ;;  %v3779_v58 = vld [vmem:[#allocation3 + $0x2c0] sm:$0xff]  }
 0x741   : > { %v1856_v26 = vadd.f32 %v3535_v25, %v2963_v60  ;;  %v1847_v27 = vpop.f32.mrb[57].mxu1  ;;  %3609 = vmatprep.subr.bf16.mxu0 %v3773_v59  ;;  %3637 = vmatprep.subr.bf16.mxu1 %v3779_v58 }
 0x742   : > { %v1848_v28 = vadd.f32 %v2963_v60, %v1847_v27  ;;  %v3536_v29 = vpop.f32.mrb[58].mxu1  ;;  %3561 = vmatprep.mubr.bf16.mxu0 %v1896_v24 }
 0x743   : > { %v1859_v30 = vadd.f32 %v3536_v29, %v2963_v60  ;;  %v1850_v31 = vpop.f32.mrb[59].mxu1  ;;  %3562 = vmatmul.mubr.bf16.gmra.mrb[68].mxu0 %v1897_v23  ;;  %v1888_v33 = vmax.f32 %v1856_v26, 0.0 }
 0x744   : > { %v1851_v32 = vadd.f32 %v2963_v60, %v1850_v31  ;;  %v1886_v35 = vmax.f32 %v1848_v28, 0.0  ;;  %3610 = vmatpush3.bf16.msra.mxu0 %v3773_v59  ;;  %v3780_v59 = vld [vmem:[#allocation3 + $0x2c8] sm:$0xff]  }
 0x745   : > { %v1889_v34 = vmax.f32 %v1859_v30, 0.0 }
 0x746   : > { %v1887_v36 = vmax.f32 %v1851_v32, 0.0 }
 0x747   : > { %v1899_v37 = vpack.c.bf16 %v1889_v34, %v1888_v33 }
 0x748   : > { %v1898_v38 = vpack.c.bf16 %v1887_v36, %v1886_v35  ;;  %v3539_v39 = vpop.f32.mrb[60].mxu1 }
 0x749   : > { %v1872_v40 = vadd.f32 %v3539_v39, %v2963_v60  ;;  %v1863_v41 = vpop.f32.mrb[61].mxu1 }
 0x74a   : > { %v1864_v42 = vadd.f32 %v2963_v60, %v1863_v41  ;;  %v3540_v43 = vpop.f32.mrb[62].mxu1  ;;  %3565 = vmatprep.mubr.bf16.mxu0 %v1898_v38 }
 0x74b   : > { %v1875_v44 = vadd.f32 %v3540_v43, %v2963_v60  ;;  %v1866_v45 = vpop.f32.mrb[63].mxu1  ;;  %3566 = vmatmul.mubr.bf16.gmra.mrb[72].mxu0 %v1899_v37  ;;  %v1892_v47 = vmax.f32 %v1872_v40, 0.0 }
 0x74c   : > { %v1867_v46 = vadd.f32 %v2963_v60, %v1866_v45  ;;  %v1890_v49 = vmax.f32 %v1864_v42, 0.0  ;;  %v3774_v60 = vld [vmem:[#allocation3 + $0x298] sm:$0xff]  }
 0x74d   : > { %v1893_v48 = vmax.f32 %v1875_v44, 0.0  ;;  %3611 = vmatprep.subr.bf16.mxu0 %v3774_v60 }
 0x74e   : > { %v1891_v50 = vmax.f32 %v1867_v46, 0.0  ;;  %3612 = vmatpush3.bf16.msra.mxu0 %v3774_v60  ;;  %v3781_v60 = vld [vmem:[#allocation3 + $0x2d0] sm:$0xff]  }
 0x74f   : > { %v1901_v51 = vpack.c.bf16 %v1893_v48, %v1892_v47  ;;  %3613 = vmatprep.subr.bf16.mxu0 %v3775_v54 }
 0x750   : > { %v1900_v52 = vpack.c.bf16 %v1891_v50, %v1890_v49 }
 0x752   : > { %3569 = vmatprep.mubr.bf16.mxu0 %v1900_v52  ;;  %3614 = vmatpush3.bf16.msra.mxu0 %v3775_v54 }
 0x753   : > { %3570 = vmatmul.mubr.bf16.gmra.mrb[76].mxu0 %v1901_v51  ;;  %3615 = vmatprep.subr.bf16.mxu0 %v3776_v55 }
 0x756   : > { %3616 = vmatpush3.bf16.msra.mxu0 %v3776_v55  ;;  %v3783_v55 = vld [vmem:[#allocation3 + $0x2e0] sm:$0xff]  }
 0x757   : > { %3617 = vmatprep.subr.bf16.mxu0 %v3777_v56 }
 0x75a   : > { %3618 = vmatpush3.bf16.msra.mxu0 %v3777_v56  ;;  %v3784_v56 = vld [vmem:[#allocation3 + $0x2e8] sm:$0xff]  }
 0x75b   : > { %3619 = vmatprep.subr.bf16.mxu0 %v3778_v57 }
 0x75e   : > { %3620 = vmatpush3.bf16.msra.mxu0 %v3778_v57  ;;  %v3785_v57 = vld [vmem:[#allocation3 + $0x2f0] sm:$0xff]  }
 0x80e   : > { %v3559_v62 = vpop.f32.mrb[64].mxu0 }
 0x80f   : > { %v2034_v63 = vadd.f32 %v3559_v62, %v2973_v61  ;;  %v2025_v0 = vpop.f32.mrb[65].mxu0  ;;  %v2983_v62 = vld [vmem:[%s3996_s2 + $0x9] ss:$0 sm:$0xff] }
 0x810   : > { %v2026_v1 = vadd.f32 %v2973_v61, %v2025_v0  ;;  %v3560_v2 = vpop.f32.mrb[66].mxu0 }
 0x811   : > { %v2037_v3 = vadd.f32 %v3560_v2, %v2973_v61  ;;  %v2028_v4 = vpop.f32.mrb[67].mxu0  ;;  %v2090_v6 = vmax.f32 %v2034_v63, 0.0 }
 0x812   : > { %v2029_v5 = vadd.f32 %v2973_v61, %v2028_v4  ;;  %v2088_v8 = vmax.f32 %v2026_v1, 0.0 }
 0x813   : > { %v2091_v7 = vmax.f32 %v2037_v3, 0.0 }
 0x814   : > { %v2089_v9 = vmax.f32 %v2029_v5, 0.0 }
 0x815   : > { %v2105_v10 = vpack.c.bf16 %v2091_v7, %v2090_v6 }
 0x816   : > { %v2104_v11 = vpack.c.bf16 %v2089_v9, %v2088_v8  ;;  %v3563_v12 = vpop.f32.mrb[68].mxu0 }
 0x817   : > { %v2050_v13 = vadd.f32 %v3563_v12, %v2973_v61  ;;  %v2041_v14 = vpop.f32.mrb[69].mxu0 }
 0x818   : > { %v2042_v15 = vadd.f32 %v2973_v61, %v2041_v14  ;;  %v3564_v16 = vpop.f32.mrb[70].mxu0  ;;  %3589 = vmatprep.mubr.bf16.mxu1 %v2104_v11 }
 0x819   : > { %v2053_v17 = vadd.f32 %v3564_v16, %v2973_v61  ;;  %v2044_v18 = vpop.f32.mrb[71].mxu0  ;;  %3590 = vmatmul.mubr.bf16.vlgmr.msra.gmra.mrb[64].mxu1 %v2105_v10  ;;  %v2094_v20 = vmax.f32 %v2050_v13, 0.0 }
 0x81a   : > { %v2045_v19 = vadd.f32 %v2973_v61, %v2044_v18  ;;  %v2092_v22 = vmax.f32 %v2042_v15, 0.0  ;;  %3638 = vmatpush3.bf16.msra.mxu1 %v3779_v58  ;;  %v3786_v58 = vld [vmem:[#allocation3 + $0x2f8] sm:$0xff]  }
 0x81b   : > { %v2095_v21 = vmax.f32 %v2053_v17, 0.0  ;;  %3639 = vmatprep.subr.bf16.mxu1 %v3780_v59 }
 0x81c   : > { %v2093_v23 = vmax.f32 %v2045_v19, 0.0 }
 0x81d   : > { %v2107_v24 = vpack.c.bf16 %v2095_v21, %v2094_v20 }
 0x81e   : > { %v2106_v25 = vpack.c.bf16 %v2093_v23, %v2092_v22  ;;  %v3567_v26 = vpop.f32.mrb[72].mxu0  ;;  %3640 = vmatpush3.bf16.msra.mxu1 %v3780_v59  ;;  %v2993_v59 = vld [vmem:[%s3996_s2 + $0xa] ss:$0 sm:$0xff] }
 0x81f   : > { %v2066_v27 = vadd.f32 %v3567_v26, %v2973_v61  ;;  %v2057_v28 = vpop.f32.mrb[73].mxu0  ;;  %3641 = vmatprep.subr.bf16.mxu1 %v3781_v60 }
 0x820   : > { %v2058_v29 = vadd.f32 %v2973_v61, %v2057_v28  ;;  %v3568_v30 = vpop.f32.mrb[74].mxu0  ;;  %3593 = vmatprep.mubr.bf16.mxu1 %v2106_v25 }
 0x821   : > { %v2069_v31 = vadd.f32 %v3568_v30, %v2973_v61  ;;  %v2060_v32 = vpop.f32.mrb[75].mxu0  ;;  %3594 = vmatmul.mubr.bf16.gmra.mrb[68].mxu1 %v2107_v24  ;;  %v2098_v34 = vmax.f32 %v2066_v27, 0.0 }
 0x822   : > { %v2061_v33 = vadd.f32 %v2973_v61, %v2060_v32  ;;  %v2096_v36 = vmax.f32 %v2058_v29, 0.0  ;;  %3642 = vmatpush3.bf16.msra.mxu1 %v3781_v60 }
 0x823   : > { %v2099_v35 = vmax.f32 %v2069_v31, 0.0 }
 0x824   : > { %v2097_v37 = vmax.f32 %v2061_v33, 0.0 }
 0x825   : > { %v2109_v38 = vpack.c.bf16 %v2099_v35, %v2098_v34 }
 0x826   : > { %v2108_v39 = vpack.c.bf16 %v2097_v37, %v2096_v36  ;;  %v3571_v40 = vpop.f32.mrb[76].mxu0 }
 0x827   : > { %v2082_v41 = vadd.f32 %v3571_v40, %v2973_v61  ;;  %v2073_v42 = vpop.f32.mrb[77].mxu0 }
 0x828   : > { %v2074_v43 = vadd.f32 %v2973_v61, %v2073_v42  ;;  %v3572_v44 = vpop.f32.mrb[78].mxu0  ;;  %3597 = vmatprep.mubr.bf16.mxu1 %v2108_v39 }
 0x829   : > { %v2085_v45 = vadd.f32 %v3572_v44, %v2973_v61  ;;  %v2076_v46 = vpop.f32.mrb[79].mxu0  ;;  %3598 = vmatmul.mubr.bf16.gmra.mrb[72].mxu1 %v2109_v38  ;;  %v2102_v48 = vmax.f32 %v2082_v41, 0.0 }
 0x82a   : > { %v2077_v47 = vadd.f32 %v2973_v61, %v2076_v46  ;;  %v2100_v50 = vmax.f32 %v2074_v43, 0.0  ;;  %v3782_v61 = vld [vmem:[#allocation3 + $0x2d8] sm:$0xff]  }
 0x82b   : > { %v2103_v49 = vmax.f32 %v2085_v45, 0.0  ;;  %3643 = vmatprep.subr.bf16.mxu1 %v3782_v61 }
 0x82c   : > { %v2101_v51 = vmax.f32 %v2077_v47, 0.0  ;;  %3644 = vmatpush3.bf16.msra.mxu1 %v3782_v61 }
 0x82d   : > { %v2111_v52 = vpack.c.bf16 %v2103_v49, %v2102_v48  ;;  %3645 = vmatprep.subr.bf16.mxu1 %v3783_v55 }
 0x82e   : > { %v2110_v53 = vpack.c.bf16 %v2101_v51, %v2100_v50 }
 0x830   : > { %3601 = vmatprep.mubr.bf16.mxu1 %v2110_v53  ;;  %3646 = vmatpush3.bf16.msra.mxu1 %v3783_v55 }
 0x831   : > { %3602 = vmatmul.mubr.bf16.gmra.mrb[76].mxu1 %v2111_v52  ;;  %3647 = vmatprep.subr.bf16.mxu1 %v3784_v56 }
 0x834   : > { %3648 = vmatpush3.bf16.msra.mxu1 %v3784_v56 }
 0x835   : > { %3649 = vmatprep.subr.bf16.mxu1 %v3785_v57 }
 0x838   : > { %3650 = vmatpush3.bf16.msra.mxu1 %v3785_v57 }
 0x839   : > { %3651 = vmatprep.subr.bf16.mxu1 %v3786_v58 }
 0x83c   : > { %3652 = vmatpush3.bf16.msra.mxu1 %v3786_v58 }
 0x8ec   : > { %v3591_v63 = vpop.f32.mrb[64].mxu1 }
 0x8ed   : > { %v2244_v0 = vadd.f32 %v3591_v63, %v2983_v62  ;;  %v2235_v1 = vpop.f32.mrb[65].mxu1 }
 0x8ee   : > { %v2236_v2 = vadd.f32 %v2983_v62, %v2235_v1  ;;  %v3592_v3 = vpop.f32.mrb[66].mxu1 }
 0x8ef   : > { %v2247_v4 = vadd.f32 %v3592_v3, %v2983_v62  ;;  %v2238_v5 = vpop.f32.mrb[67].mxu1  ;;  %v2300_v7 = vmax.f32 %v2244_v0, 0.0 }
 0x8f0   : > { %v2239_v6 = vadd.f32 %v2983_v62, %v2238_v5  ;;  %v2298_v9 = vmax.f32 %v2236_v2, 0.0 }
 0x8f1   : > { %v2301_v8 = vmax.f32 %v2247_v4, 0.0 }
 0x8f2   : > { %v2299_v10 = vmax.f32 %v2239_v6, 0.0 }
 0x8f3   : > { %v2315_v11 = vpack.c.bf16 %v2301_v8, %v2300_v7 }
 0x8f4   : > { %v2314_v12 = vpack.c.bf16 %v2299_v10, %v2298_v9  ;;  %v3595_v13 = vpop.f32.mrb[68].mxu1 }
 0x8f5   : > { %v2260_v14 = vadd.f32 %v3595_v13, %v2983_v62  ;;  %v2251_v15 = vpop.f32.mrb[69].mxu1 }
 0x8f6   : > { %v2252_v16 = vadd.f32 %v2983_v62, %v2251_v15  ;;  %v3596_v17 = vpop.f32.mrb[70].mxu1  ;;  %3621 = vmatprep.mubr.bf16.mxu0 %v2314_v12 }
 0x8f7   : > { %v2263_v18 = vadd.f32 %v3596_v17, %v2983_v62  ;;  %v2254_v19 = vpop.f32.mrb[71].mxu1  ;;  %3622 = vmatmul.mubr.bf16.vlgmr.msra.gmra.mrb[80].mxu0 %v2315_v11  ;;  %v2304_v21 = vmax.f32 %v2260_v14, 0.0 }
 0x8f8   : > { %v2255_v20 = vadd.f32 %v2983_v62, %v2254_v19  ;;  %v2302_v23 = vmax.f32 %v2252_v16, 0.0 }
 0x8f9   : > { %v2305_v22 = vmax.f32 %v2263_v18, 0.0 }
 0x8fa   : > { %v2303_v24 = vmax.f32 %v2255_v20, 0.0 }
 0x8fb   : > { %v2317_v25 = vpack.c.bf16 %v2305_v22, %v2304_v21 }
 0x8fc   : > { %v2316_v26 = vpack.c.bf16 %v2303_v24, %v2302_v23  ;;  %v3599_v27 = vpop.f32.mrb[72].mxu1 }
 0x8fd   : > { %v2276_v28 = vadd.f32 %v3599_v27, %v2983_v62  ;;  %v2267_v29 = vpop.f32.mrb[73].mxu1 }
 0x8fe   : > { %v2268_v30 = vadd.f32 %v2983_v62, %v2267_v29  ;;  %v3600_v31 = vpop.f32.mrb[74].mxu1  ;;  %3625 = vmatprep.mubr.bf16.mxu0 %v2316_v26 }
 0x8ff   : > { %v2279_v32 = vadd.f32 %v3600_v31, %v2983_v62  ;;  %v2270_v33 = vpop.f32.mrb[75].mxu1  ;;  %3626 = vmatmul.mubr.bf16.gmra.mrb[84].mxu0 %v2317_v25  ;;  %v2308_v35 = vmax.f32 %v2276_v28, 0.0 }
 0x900   : > { %v2271_v34 = vadd.f32 %v2983_v62, %v2270_v33  ;;  %v2306_v37 = vmax.f32 %v2268_v30, 0.0 }
 0x901   : > { %v2309_v36 = vmax.f32 %v2279_v32, 0.0 }
 0x902   : > { %v2307_v38 = vmax.f32 %v2271_v34, 0.0 }
 0x903   : > { %v2319_v39 = vpack.c.bf16 %v2309_v36, %v2308_v35 }
 0x904   : > { %v2318_v40 = vpack.c.bf16 %v2307_v38, %v2306_v37  ;;  %v3603_v41 = vpop.f32.mrb[76].mxu1 }
 0x905   : > { %v2292_v42 = vadd.f32 %v3603_v41, %v2983_v62  ;;  %v2283_v43 = vpop.f32.mrb[77].mxu1 }
 0x906   : > { %v2284_v44 = vadd.f32 %v2983_v62, %v2283_v43  ;;  %v3604_v45 = vpop.f32.mrb[78].mxu1  ;;  %3629 = vmatprep.mubr.bf16.mxu0 %v2318_v40 }
 0x907   : > { %v2295_v46 = vadd.f32 %v3604_v45, %v2983_v62  ;;  %v2286_v47 = vpop.f32.mrb[79].mxu1  ;;  %3630 = vmatmul.mubr.bf16.gmra.mrb[88].mxu0 %v2319_v39  ;;  %v2312_v49 = vmax.f32 %v2292_v42, 0.0 }
 0x908   : > { %v2287_v48 = vadd.f32 %v2983_v62, %v2286_v47  ;;  %v2310_v51 = vmax.f32 %v2284_v44, 0.0 }
 0x909   : > { %v2313_v50 = vmax.f32 %v2295_v46, 0.0 }
 0x90a   : > { %v2311_v52 = vmax.f32 %v2287_v48, 0.0 }
 0x90b   : > { %v2321_v53 = vpack.c.bf16 %v2313_v50, %v2312_v49 }
 0x90c   : > { %v2320_v54 = vpack.c.bf16 %v2311_v52, %v2310_v51  ;;  %v3003_v52 = vld [vmem:[%s3996_s2 + $0xb] ss:$0 sm:$0xff] }
 0x90e   : > { %3633 = vmatprep.mubr.bf16.mxu0 %v2320_v54 }
 0x90f   : > { %3634 = vmatmul.mubr.bf16.gmra.mrb[92].mxu0 %v2321_v53 }
 0x9ca   : > { %v3623_v60 = vpop.f32.mrb[80].mxu0 }
 0x9cb   : > { %v2454_v61 = vadd.f32 %v3623_v60, %v2993_v59  ;;  %v2445_v62 = vpop.f32.mrb[81].mxu0 }
 0x9cc   : > { %v2446_v63 = vadd.f32 %v2993_v59, %v2445_v62  ;;  %v3624_v0 = vpop.f32.mrb[82].mxu0 }
 0x9cd   : > { %v2457_v1 = vadd.f32 %v3624_v0, %v2993_v59  ;;  %v2448_v2 = vpop.f32.mrb[83].mxu0  ;;  %v2510_v4 = vmax.f32 %v2454_v61, 0.0 }
 0x9ce   : > { %v2449_v3 = vadd.f32 %v2993_v59, %v2448_v2  ;;  %v2508_v6 = vmax.f32 %v2446_v63, 0.0 }
 0x9cf   : > { %v2511_v5 = vmax.f32 %v2457_v1, 0.0 }
 0x9d0   : > { %v2509_v7 = vmax.f32 %v2449_v3, 0.0 }
 0x9d1   : > { %v2525_v8 = vpack.c.bf16 %v2511_v5, %v2510_v4 }
 0x9d2   : > { %v2524_v9 = vpack.c.bf16 %v2509_v7, %v2508_v6  ;;  %v3627_v10 = vpop.f32.mrb[84].mxu0 }
 0x9d3   : > { %2533 = vst [vmem:[#allocation2 + $0x8] sm:$0xff] %v2525_v8  ;;  %v2470_v11 = vadd.f32 %v3627_v10, %v2993_v59  ;;  %v2461_v12 = vpop.f32.mrb[85].mxu0 }
 0x9d4   : > { %2532 = vst [vmem:[#allocation2] sm:$0xff] %v2524_v9  ;;  %v2462_v13 = vadd.f32 %v2993_v59, %v2461_v12  ;;  %v3628_v14 = vpop.f32.mrb[86].mxu0  ;;  %3653 = vmatprep.mubr.bf16.mxu1 %v2524_v9 }
 0x9d5   : > { %v2473_v15 = vadd.f32 %v3628_v14, %v2993_v59  ;;  %v2464_v16 = vpop.f32.mrb[87].mxu0  ;;  %3654 = vmatmul.mubr.bf16.vlgmr.msra.gmra.mrb[80].mxu1 %v2525_v8  ;;  %v2514_v18 = vmax.f32 %v2470_v11, 0.0 }
 0x9d6   : > { %v2465_v17 = vadd.f32 %v2993_v59, %v2464_v16  ;;  %v2512_v20 = vmax.f32 %v2462_v13, 0.0 }
 0x9d7   : > { %v2515_v19 = vmax.f32 %v2473_v15, 0.0 }
 0x9d8   : > { %v2513_v21 = vmax.f32 %v2465_v17, 0.0 }
 0x9d9   : > { %v2527_v22 = vpack.c.bf16 %v2515_v19, %v2514_v18 }
 0x9da   : > { %v2526_v23 = vpack.c.bf16 %v2513_v21, %v2512_v20  ;;  %v3631_v24 = vpop.f32.mrb[88].mxu0 }
 0x9db   : > { %2535 = vst [vmem:[#allocation2 + $0x18] sm:$0xff] %v2527_v22  ;;  %v2486_v25 = vadd.f32 %v3631_v24, %v2993_v59  ;;  %v2477_v26 = vpop.f32.mrb[89].mxu0 }
 0x9dc   : > { %2534 = vst [vmem:[#allocation2 + $0x10] sm:$0xff] %v2526_v23  ;;  %v2478_v27 = vadd.f32 %v2993_v59, %v2477_v26  ;;  %v3632_v28 = vpop.f32.mrb[90].mxu0  ;;  %3657 = vmatprep.mubr.bf16.mxu1 %v2526_v23 }
 0x9dd   : > { %v2489_v29 = vadd.f32 %v3632_v28, %v2993_v59  ;;  %v2480_v30 = vpop.f32.mrb[91].mxu0  ;;  %3658 = vmatmul.mubr.bf16.gmra.mrb[84].mxu1 %v2527_v22  ;;  %v2518_v32 = vmax.f32 %v2486_v25, 0.0 }
 0x9de   : > { %v2481_v31 = vadd.f32 %v2993_v59, %v2480_v30  ;;  %v2516_v34 = vmax.f32 %v2478_v27, 0.0 }
 0x9df   : > { %v2519_v33 = vmax.f32 %v2489_v29, 0.0 }
 0x9e0   : > { %v2517_v35 = vmax.f32 %v2481_v31, 0.0 }
 0x9e1   : > { %v2529_v36 = vpack.c.bf16 %v2519_v33, %v2518_v32 }
 0x9e2   : > { %v2528_v37 = vpack.c.bf16 %v2517_v35, %v2516_v34  ;;  %v3635_v38 = vpop.f32.mrb[92].mxu0 }
 0x9e3   : > { %2537 = vst [vmem:[#allocation2 + $0x28] sm:$0xff] %v2529_v36  ;;  %v2502_v39 = vadd.f32 %v3635_v38, %v2993_v59  ;;  %v2493_v40 = vpop.f32.mrb[93].mxu0 }
 0x9e4   : > { %2536 = vst [vmem:[#allocation2 + $0x20] sm:$0xff] %v2528_v37  ;;  %v2494_v41 = vadd.f32 %v2993_v59, %v2493_v40  ;;  %v3636_v42 = vpop.f32.mrb[94].mxu0  ;;  %3661 = vmatprep.mubr.bf16.mxu1 %v2528_v37 }
 0x9e5   : > { %v2505_v43 = vadd.f32 %v3636_v42, %v2993_v59  ;;  %v2496_v44 = vpop.f32.mrb[95].mxu0  ;;  %3662 = vmatmul.mubr.bf16.gmra.mrb[88].mxu1 %v2529_v36  ;;  %v2522_v46 = vmax.f32 %v2502_v39, 0.0 }
 0x9e6   : > { %v2497_v45 = vadd.f32 %v2993_v59, %v2496_v44  ;;  %v2520_v48 = vmax.f32 %v2494_v41, 0.0 }
 0x9e7   : > { %v2523_v47 = vmax.f32 %v2505_v43, 0.0 }
 0x9e8   : > { %v2521_v49 = vmax.f32 %v2497_v45, 0.0 }
 0x9e9   : > { %v2531_v50 = vpack.c.bf16 %v2523_v47, %v2522_v46 }
 0x9ea   : > { %v2530_v51 = vpack.c.bf16 %v2521_v49, %v2520_v48 }
 0x9eb   : > { %2539 = vst [vmem:[#allocation2 + $0x38] sm:$0xff] %v2531_v50 }
 0x9ec   : > { %2538 = vst [vmem:[#allocation2 + $0x30] sm:$0xff] %v2530_v51  ;;  %3665 = vmatprep.mubr.bf16.mxu1 %v2530_v51 }
 0x9ed   : > { %3666 = vmatmul.mubr.bf16.gmra.mrb[92].mxu1 %v2531_v50 }
 0xaa8   : > { %v3655_v53 = vpop.f32.mrb[80].mxu1 }
 0xaa9   : > { %v2664_v54 = vadd.f32 %v3655_v53, %v3003_v52  ;;  %v2655_v55 = vpop.f32.mrb[81].mxu1 }
 0xaaa   : > { %v2656_v56 = vadd.f32 %v3003_v52, %v2655_v55  ;;  %v3656_v57 = vpop.f32.mrb[82].mxu1 }
 0xaab   : > { %v2667_v58 = vadd.f32 %v3656_v57, %v3003_v52  ;;  %v2658_v59 = vpop.f32.mrb[83].mxu1  ;;  %v2720_v61 = vmax.f32 %v2664_v54, 0.0 }
 0xaac   : > { %v2659_v60 = vadd.f32 %v3003_v52, %v2658_v59  ;;  %v2718_v63 = vmax.f32 %v2656_v56, 0.0 }
 0xaad   : > { %v2721_v62 = vmax.f32 %v2667_v58, 0.0 }
 0xaae   : > { %v2719_v0 = vmax.f32 %v2659_v60, 0.0 }
 0xaaf   : > { %v3054_v1 = vpack.c.bf16 %v2721_v62, %v2720_v61 }
 0xab0   : > { %v3049_v2 = vpack.c.bf16 %v2719_v0, %v2718_v63  ;;  %v3659_v3 = vpop.f32.mrb[84].mxu1 }
 0xab1   : > { %3086 = vst [vmem:[%s3981_s11 + $0x8] sm:$0xff] %v3054_v1   ;;  %v2680_v4 = vadd.f32 %v3659_v3, %v3003_v52  ;;  %v2671_v5 = vpop.f32.mrb[85].mxu1 }
 0xab2   : > { %3050 = vst [vmem:[%s3981_s11] sm:$0xff] %v3049_v2   ;;  %v2672_v6 = vadd.f32 %v3003_v52, %v2671_v5  ;;  %v3660_v7 = vpop.f32.mrb[86].mxu1 }
 0xab3   : > { %v2683_v8 = vadd.f32 %v3660_v7, %v3003_v52  ;;  %v2674_v9 = vpop.f32.mrb[87].mxu1  ;;  %v2724_v11 = vmax.f32 %v2680_v4, 0.0 }
 0xab4   : > { %v2675_v10 = vadd.f32 %v3003_v52, %v2674_v9  ;;  %v2722_v13 = vmax.f32 %v2672_v6, 0.0 }
 0xab5   : > { %v2725_v12 = vmax.f32 %v2683_v8, 0.0 }
 0xab6   : > { %v2723_v14 = vmax.f32 %v2675_v10, 0.0 }
 0xab7   : > { %v3064_v15 = vpack.c.bf16 %v2725_v12, %v2724_v11 }
 0xab8   : > { %v3059_v16 = vpack.c.bf16 %v2723_v14, %v2722_v13  ;;  %v3663_v17 = vpop.f32.mrb[88].mxu1 }
 0xab9   : > { %3088 = vst [vmem:[%s3981_s11 + $0x18] sm:$0xff] %v3064_v15   ;;  %v2696_v18 = vadd.f32 %v3663_v17, %v3003_v52  ;;  %v2687_v19 = vpop.f32.mrb[89].mxu1 }
 0xaba   : > { %3087 = vst [vmem:[%s3981_s11 + $0x10] sm:$0xff] %v3059_v16   ;;  %v2688_v20 = vadd.f32 %v3003_v52, %v2687_v19  ;;  %v3664_v21 = vpop.f32.mrb[90].mxu1 }
 0xabb   : > { %v2699_v22 = vadd.f32 %v3664_v21, %v3003_v52  ;;  %v2690_v23 = vpop.f32.mrb[91].mxu1  ;;  %v2728_v25 = vmax.f32 %v2696_v18, 0.0 }
 0xabc   : > { %v2691_v24 = vadd.f32 %v3003_v52, %v2690_v23  ;;  %v2726_v27 = vmax.f32 %v2688_v20, 0.0 }
 0xabd   : > { %v2729_v26 = vmax.f32 %v2699_v22, 0.0 }
 0xabe   : > { %v2727_v28 = vmax.f32 %v2691_v24, 0.0 }
 0xabf   : > { %v3074_v29 = vpack.c.bf16 %v2729_v26, %v2728_v25 }
 0xac0   : > { %v3069_v30 = vpack.c.bf16 %v2727_v28, %v2726_v27  ;;  %v3667_v31 = vpop.f32.mrb[92].mxu1 }
 0xac1   : > { %3090 = vst [vmem:[%s3981_s11 + $0x28] sm:$0xff] %v3074_v29   ;;  %v2712_v32 = vadd.f32 %v3667_v31, %v3003_v52  ;;  %v2703_v33 = vpop.f32.mrb[93].mxu1 }
 0xac2   : > { %3089 = vst [vmem:[%s3981_s11 + $0x20] sm:$0xff] %v3069_v30   ;;  %v2704_v34 = vadd.f32 %v3003_v52, %v2703_v33  ;;  %v3668_v35 = vpop.f32.mrb[94].mxu1 }
 0xac3   : > { %v2715_v36 = vadd.f32 %v3668_v35, %v3003_v52  ;;  %v2706_v37 = vpop.f32.mrb[95].mxu1  ;;  %v2732_v39 = vmax.f32 %v2712_v32, 0.0 }
 0xac4   : > { %v2707_v38 = vadd.f32 %v3003_v52, %v2706_v37  ;;  %v2730_v41 = vmax.f32 %v2704_v34, 0.0 }
 0xac5   : > { %v2733_v40 = vmax.f32 %v2715_v36, 0.0 }
 0xac6   : > { %v2731_v42 = vmax.f32 %v2707_v38, 0.0 }
 0xac7   : > { %v3084_v43 = vpack.c.bf16 %v2733_v40, %v2732_v39 }
 0xac8   : > { %v3079_v44 = vpack.c.bf16 %v2731_v42, %v2730_v41 }
 0xac9   : > { %3092 = vst [vmem:[%s3981_s11 + $0x38] sm:$0xff] %v3084_v43  }
 0xaca   : > { %3091 = vst [vmem:[%s3981_s11 + $0x30] sm:$0xff] %v3079_v44  }
 0xacb PF: > { %s14_s12 = sadd.s32 1, %s3825_s12  }
 0xacc   : > { %p11_p3 = scmp.ge.s32.totalorder %s14_s12, 6  }
 0xace   :  { %13 = sbr.rel (!%p11_p3) target bundleno = 1 (0x1), region = 89 }
 0xad5   :  { %2836 = vsyncpa [#allocation4], 1 }
 0xad6   :  { %2838 = vsyncpa [#allocation4 + $0x1], 1 }

</bundles_post_ra>
